<compile_context>
chip_gen: v6e
topology: v6e:2x2x1
jax: 0.10.0
libtpu: 0.0.40
codegen_flags: <defaults>
</compile_context>

<pallas_src>
import math

import jax
import jax.numpy as jnp
from jax.experimental import pallas as pl
from jax.experimental.pallas import tpu as pltpu


def _make_kernel(num_heads, matmul_dtype, approx_reciprocal):
    def kernel(pe_ref, x_ref, y_ref, wqv_ref, bqv_ref, wk_ref, bk_ref,
               wd_ref, bd_ref, out_ref):
        bt, sq, d = x_ref.shape
        sk = y_ref.shape[1]
        depth = d // num_heads
        scale = 1.0 / math.sqrt(float(depth))
        md = matmul_dtype

        # Positional-encoding quirk: pe row is per *batch element*, broadcast
        # over the sequence dimension (matches the PyTorch module exactly).
        pe = pe_ref[...].astype(jnp.float32)                       # (bt, d)
        x = x_ref[...].astype(jnp.float32) + pe[:, None, :]        # (bt, sq, d)
        y = y_ref[...].astype(jnp.float32) + pe[:, None, :]        # (bt, sk, d)

        xf = x.reshape(bt * sq, d).astype(md)                      # flattened slabs
        yf = y.reshape(bt * sk, d).astype(md)

        # Fused Q/V projection (x @ [wq | wv]): one (bt*sq, d) x (d, 2d) matmul.
        qv = jnp.dot(xf, wqv_ref[...],
                     preferred_element_type=jnp.float32) + bqv_ref[...]   # (bt*sq, 2d)
        k2 = jnp.dot(yf, wk_ref[...],
                     preferred_element_type=jnp.float32) + bk_ref[...]    # (bt*sk, d)
        q2 = qv[:, :d].astype(md)
        v2 = qv[:, d:].astype(md)
        k2 = k2.astype(md)

        def split_heads(t2, s):
            # (bt*s, d) -> (num_heads*bt, s, depth) using only leading-dim
            # reshapes, static lane slices and a major-axis stack.
            t3 = t2.reshape(bt, s, d)
            heads = [t3[:, :, h * depth:(h + 1) * depth] for h in range(num_heads)]
            return jnp.stack(heads, axis=0).reshape(num_heads * bt, s, depth)

        qh = split_heads(q2, sq)
        kh = split_heads(k2, sk)
        vh = split_heads(v2, sq)   # v comes from x (requires sq == sk, as in torch)

        # Batched-over-(head, batch) attention: single dot_general per step,
        # contracting on the last axes (no explicit kh.T transpose).
        logits = jnp.einsum("bqd,bkd->bqk", qh, kh,
                            preferred_element_type=jnp.float32) * scale   # (H*bt, sq, sk)
        m = jnp.max(logits, axis=-1, keepdims=True)
        e = jnp.exp(logits - m)
        denom = jnp.sum(e, axis=-1, keepdims=True)
        p = e * pl.reciprocal(denom, approx=approx_reciprocal)            # softmax

        o = jnp.einsum("bqk,bkd->bqd", p.astype(md), vh,
                       preferred_element_type=jnp.float32)                # (H*bt, sq, depth)

        # Merge heads back onto the lane dimension (no scratch round-trip).
        o4 = o.reshape(num_heads, bt, sq, depth)
        concat = jnp.concatenate([o4[h] for h in range(num_heads)], axis=-1)  # (bt, sq, d)

        out = jnp.dot(concat.reshape(bt * sq, d).astype(md), wd_ref[...],
                      preferred_element_type=jnp.float32) + bd_ref[...]
        # Single lane-dense full-tile store.
        out_ref[...] = out.reshape(bt, sq, d).astype(out_ref.dtype)

    return kernel


def _pick_batch_tile(B, Sq, Sk, D, num_heads, vmem_budget_bytes=24 << 20):
    """How many batch elements to process per grid step.

    Targets: (a) Bt*Sq rows large enough to fill the MXU M dimension and
    amortize per-step overhead, (b) working set under a conservative VMEM
    budget (v5e scoped default 16 MiB; v7x only has 64 MiB physical per TC),
    (c) keep >= 2 grid steps when affordable so both v7x TensorCores get work
    through the 'parallel' grid dimension.
    """
    divisors = [d for d in range(1, B + 1) if B % d == 0]

    def est_bytes(bt):
        f32 = 4
        io_blocks = 2 * bt * (2 * Sq + Sk) * D * f32              # double-buffered x/y/out
        weights = 2 * (2 * D * D + 2 * D * D + 4 * D) * f32       # weights + biases (<=2x)
        interm = bt * (4 * Sq + 2 * Sk) * D * f32                 # q/k/v/concat slabs
        attn = 2 * bt * num_heads * Sq * Sk * f32                 # logits + probs
        return io_blocks + weights + interm + attn

    fits = [d for d in divisors if est_bytes(d) <= vmem_budget_bytes] or [1]
    sized = [d for d in fits if d * max(Sq, Sk) <= 512] or [min(fits)]
    bt = max(sized)
    if B // bt < 2:                      # prefer >=2 parallel steps (v7x megacore)
        alt = [d for d in sized if B // d >= 2]
        if alt and max(alt) * Sq >= 128:
            bt = max(alt)
    return bt


def sequential_cross_attention_block(x, y, params, num_heads, *,
                                     matmul_dtype=jnp.float32,
                                     approx_reciprocal=False,
                                     batch_tile=None):
    """x: (B, Sq, D), y: (B, Sk, D). Returns (B, Sq, D).

    matmul_dtype=jnp.bfloat16 feeds bf16 to the MXU with f32 accumulation
    (recommended on v6e/v7x when tolerance allows); default is exact f32.
    """
    B, Sq, D = x.shape
    By, Sk, Dy = y.shape
    assert By == B and Dy == D
    assert D % num_heads == 0
    # v is taken from x, so (like the PyTorch module) attention_weights @ v
    # requires matching sequence lengths.
    assert Sq == Sk, "SequentialCrossAttentionBlock requires x and y with equal seq len"

    # PositionalEncoding table; the module adds pe[batch_index] to every position.
    pos = jnp.arange(B, dtype=jnp.float32)[:, None]
    div = jnp.exp(jnp.arange(0, D, 2, dtype=jnp.float32) * (-math.log(10000.0) / D))
    pe = jnp.zeros((B, D), jnp.float32)
    pe = pe.at[:, 0::2].set(jnp.sin(pos * div))
    pe = pe.at[:, 1::2].set(jnp.cos(pos * div))

    # torch Linear stores (out, in); transpose host-side so the kernel does x @ W + b.
    # Q and V consume the same input -> fuse into one (D, 2D) weight.
    wqv = jnp.concatenate([params["wq"].T, params["wv"].T], axis=1).astype(matmul_dtype)
    bqv = jnp.concatenate([params["bq"], params["bv"]]).reshape(1, 2 * D).astype(jnp.float32)
    wk = params["wk"].T.astype(matmul_dtype)
    bk = params["bk"].reshape(1, D).astype(jnp.float32)
    wd = params["wd"].T.astype(matmul_dtype)
    bd = params["bd"].reshape(1, D).astype(jnp.float32)

    bt = batch_tile or _pick_batch_tile(B, Sq, Sk, D, num_heads)
    assert B % bt == 0
    grid = (B // bt,)

    kernel = _make_kernel(num_heads, matmul_dtype, approx_reciprocal)

    depth = D // num_heads
    flops = 2 * B * D * D * (3 * Sq + Sk) + 4 * B * num_heads * Sq * Sk * depth
    itemsize = jnp.dtype(matmul_dtype).itemsize
    cost = pl.CostEstimate(
        flops=flops,
        transcendentals=B * num_heads * Sq * Sk,
        bytes_accessed=4 * (2 * B * Sq * D + B * Sk * D + B * D)
        + itemsize * (4 * D * D) + 4 * (6 * D),
    )

    def build_and_call(single_buffer_weights):
        def const_spec(shape):
            kwargs = {}
            if single_buffer_weights:
                # Weight/bias blocks never change across the grid -> one buffer
                # is enough (halves weight VMEM; matters at large D on v7x).
                kwargs["pipeline_mode"] = pl.Buffered(1)
            rank = len(shape)
            return pl.BlockSpec(shape, lambda b, _r=rank: (0,) * _r, **kwargs)

        grid_spec = pltpu.PrefetchScalarGridSpec(
            num_scalar_prefetch=0,
            grid=grid,
            in_specs=[
                pl.BlockSpec((bt, D), lambda b: (b, 0)),           # pe rows
                pl.BlockSpec((bt, Sq, D), lambda b: (b, 0, 0)),    # x
                pl.BlockSpec((bt, Sk, D), lambda b: (b, 0, 0)),    # y
                const_spec((D, 2 * D)), const_spec((1, 2 * D)),    # wqv, bqv
                const_spec((D, D)), const_spec((1, D)),            # wk, bk
                const_spec((D, D)), const_spec((1, D)),            # wd, bd
            ],
            out_specs=pl.BlockSpec((bt, Sq, D), lambda b: (b, 0, 0)),
        )
        return pl.pallas_call(
            kernel,
            out_shape=jax.ShapeDtypeStruct((B, Sq, D), jnp.float32),
            grid_spec=grid_spec,
            compiler_params=pltpu.CompilerParams(
                dimension_semantics=("parallel",),
                vmem_limit_bytes=32 * 1024 * 1024),
            cost_estimate=cost,
        )(pe, x, y, wqv, bqv, wk, bk, wd, bd)

    try:
        return build_and_call(single_buffer_weights=True)
    except Exception:
        # pl.Buffered(1) not supported by this jax/libtpu combo -> fall back to
        # default double-buffered weight blocks (numerically identical).
        return build_and_call(single_buffer_weights=False)


def _reference(x, y, params, num_heads, matmul_dtype=jnp.float32):
    """Pure-JAX reference reproducing the PyTorch forward (optionally with the
    same bf16 matmul-input casts as the fast kernel path), for validation."""
    B, Sq, D = x.shape
    _, Sk, _ = y.shape
    depth = D // num_heads
    md = matmul_dtype

    pos = jnp.arange(B, dtype=jnp.float32)[:, None]
    div = jnp.exp(jnp.arange(0, D, 2, dtype=jnp.float32) * (-math.log(10000.0) / D))
    pe = jnp.zeros((B, D), jnp.float32)
    pe = pe.at[:, 0::2].set(jnp.sin(pos * div))
    pe = pe.at[:, 1::2].set(jnp.cos(pos * div))

    xq = (x + pe[:, None, :]).astype(md)
    yk = (y + pe[:, None, :]).astype(md)
    q = jnp.einsum("bsd,ed->bse", xq, params["wq"].astype(md),
                   preferred_element_type=jnp.float32) + params["bq"]
    k = jnp.einsum("bsd,ed->bse", yk, params["wk"].astype(md),
                   preferred_element_type=jnp.float32) + params["bk"]
    v = jnp.einsum("bsd,ed->bse", xq, params["wv"].astype(md),
                   preferred_element_type=jnp.float32) + params["bv"]

    def split(t, S):
        return t.reshape(B, S, num_heads, depth).transpose(0, 2, 1, 3).astype(md)

    qh, kh, vh = split(q, Sq), split(k, Sk), split(v, Sq)
    logits = jnp.einsum("bhqd,bhkd->bhqk", qh, kh,
                        preferred_element_type=jnp.float32) / math.sqrt(depth)
    w = jax.nn.softmax(logits, axis=-1)
    o = jnp.einsum("bhqk,bhkd->bhqd", w.astype(md), vh,
                   preferred_element_type=jnp.float32)
    o = o.transpose(0, 2, 1, 3).reshape(B, Sq, D).astype(md)
    return jnp.einsum("bsd,ed->bse", o, params["wd"].astype(md),
                      preferred_element_type=jnp.float32) + params["bd"]


if __name__ == "__main__":
    B, Sq, Sk, D, H = 2, 8, 8, 32, 4

    key = jax.random.PRNGKey(0)
    keys = jax.random.split(key, 10)
    scale = 1.0 / math.sqrt(D)
    params = {
        "wq": jax.random.normal(keys[0], (D, D), jnp.float32) * scale,
        "bq": jax.random.normal(keys[1], (D,), jnp.float32) * 0.1,
        "wk": jax.random.normal(keys[2], (D, D), jnp.float32) * scale,
        "bk": jax.random.normal(keys[3], (D,), jnp.float32) * 0.1,
        "wv": jax.random.normal(keys[4], (D, D), jnp.float32) * scale,
        "bv": jax.random.normal(keys[5], (D,), jnp.float32) * 0.1,
        "wd": jax.random.normal(keys[6], (D, D), jnp.float32) * scale,
        "bd": jax.random.normal(keys[7], (D,), jnp.float32) * 0.1,
    }
    x = jax.random.normal(keys[8], (B, Sq, D), jnp.float32)
    y = jax.random.normal(keys[9], (B, Sk, D), jnp.float32)

    # Exact (f32) path: matches the PyTorch module's forward semantics.
    out = sequential_cross_attention_block(x, y, params, H)
    out = jax.block_until_ready(out)
    ref = _reference(x, y, params, H)
    assert out.shape == (B, Sq, D)
    assert jnp.allclose(out, ref, atol=1e-4, rtol=1e-4), "mismatch vs JAX reference (f32 path)"

    # Fast path: bf16 MXU inputs + approx reciprocal (v6e/v7x recommendation),
    # validated against a reference that applies the same bf16 casts.
    out_fast = sequential_cross_attention_block(
        x, y, params, H, matmul_dtype=jnp.bfloat16, approx_reciprocal=True)
    out_fast = jax.block_until_ready(out_fast)
    ref_fast = _reference(x, y, params, H, matmul_dtype=jnp.bfloat16)
    assert jnp.allclose(out_fast, ref_fast, atol=5e-2, rtol=5e-2), \
        "mismatch vs JAX reference (bf16 path)"

    print("KERNEL_OK")
</pallas_src>

<mosaic_0001>
module attributes {stable_mosaic.version = 11 : i64} {
  func.func @kernel(%arg0: i32, %arg1: memref<2x32xf32, #tpu.memory_space<vmem>>, %arg2: memref<2x8x32xf32, #tpu.memory_space<vmem>>, %arg3: memref<2x8x32xf32, #tpu.memory_space<vmem>>, %arg4: memref<32x64xf32, #tpu.memory_space<vmem>>, %arg5: memref<1x64xf32, #tpu.memory_space<vmem>>, %arg6: memref<32x32xf32, #tpu.memory_space<vmem>>, %arg7: memref<1x32xf32, #tpu.memory_space<vmem>>, %arg8: memref<32x32xf32, #tpu.memory_space<vmem>>, %arg9: memref<1x32xf32, #tpu.memory_space<vmem>>, %arg10: memref<2x8x32xf32, #tpu.memory_space<vmem>>) attributes {dimension_semantics = [#tpu.dimension_semantics<parallel>], iteration_bounds = array<i64: 1>, scalar_prefetch = 0 : i64, scratch_operands = 0 : i64, tpu.core_type = #tpu.core_type<tc>, window_params = [{transform_indices = @transform_0, window_bounds = array<i64: 2, 32>}, {transform_indices = @transform_1, window_bounds = array<i64: 2, 8, 32>}, {transform_indices = @transform_2, window_bounds = array<i64: 2, 8, 32>}, {pipeline_mode = #tpu.pipeline_mode<synchronous>, transform_indices = @transform_3, window_bounds = array<i64: 32, 64>}, {pipeline_mode = #tpu.pipeline_mode<synchronous>, transform_indices = @transform_4, window_bounds = array<i64: 1, 64>}, {pipeline_mode = #tpu.pipeline_mode<synchronous>, transform_indices = @transform_5, window_bounds = array<i64: 32, 32>}, {pipeline_mode = #tpu.pipeline_mode<synchronous>, transform_indices = @transform_6, window_bounds = array<i64: 1, 32>}, {pipeline_mode = #tpu.pipeline_mode<synchronous>, transform_indices = @transform_7, window_bounds = array<i64: 32, 32>}, {pipeline_mode = #tpu.pipeline_mode<synchronous>, transform_indices = @transform_8, window_bounds = array<i64: 1, 32>}, {transform_indices = @transform_9, window_bounds = array<i64: 2, 8, 32>}]} {
    %c0 = arith.constant 0 : index
    %c0_0 = arith.constant 0 : index
    %0 = vector.load %arg1[%c0, %c0_0] : memref<2x32xf32, #tpu.memory_space<vmem>>, vector<2x32xf32>
    %c0_1 = arith.constant 0 : index
    %c0_2 = arith.constant 0 : index
    %c0_3 = arith.constant 0 : index
    %1 = vector.load %arg2[%c0_1, %c0_2, %c0_3] : memref<2x8x32xf32, #tpu.memory_space<vmem>>, vector<2x8x32xf32>
    %2 = vector.shape_cast %0 : vector<2x32xf32> to vector<2x1x32xf32>
    %3 = vector.broadcast %2 : vector<2x1x32xf32> to vector<2x8x32xf32>
    %4 = arith.addf %1, %3 : vector<2x8x32xf32>
    %c0_4 = arith.constant 0 : index
    %c0_5 = arith.constant 0 : index
    %c0_6 = arith.constant 0 : index
    %5 = vector.load %arg3[%c0_4, %c0_5, %c0_6] : memref<2x8x32xf32, #tpu.memory_space<vmem>>, vector<2x8x32xf32>
    %6 = vector.shape_cast %0 : vector<2x32xf32> to vector<2x1x32xf32>
    %7 = vector.broadcast %6 : vector<2x1x32xf32> to vector<2x8x32xf32>
    %8 = arith.addf %5, %7 : vector<2x8x32xf32>
    %9 = vector.shape_cast %4 : vector<2x8x32xf32> to vector<16x32xf32>
    %10 = vector.shape_cast %8 : vector<2x8x32xf32> to vector<16x32xf32>
    %c0_7 = arith.constant 0 : index
    %c0_8 = arith.constant 0 : index
    %11 = vector.load %arg4[%c0_7, %c0_8] : memref<32x64xf32, #tpu.memory_space<vmem>>, vector<32x64xf32>
    %cst = arith.constant dense<0.000000e+00> : vector<16x64xf32>
    %12 = tpu.matmul %9, %11, %cst {dimension_numbers = #tpu.dot_dimension_numbers<[1], [0], [0], [1], [0, 0, 1, 1], [], []>} : vector<16x32xf32>, vector<32x64xf32>, vector<16x64xf32> -> vector<16x64xf32>
    %c0_9 = arith.constant 0 : index
    %c0_10 = arith.constant 0 : index
    %13 = vector.load %arg5[%c0_9, %c0_10] : memref<1x64xf32, #tpu.memory_space<vmem>>, vector<1x64xf32>
    %14 = vector.broadcast %13 : vector<1x64xf32> to vector<16x64xf32>
    %15 = arith.addf %12, %14 : vector<16x64xf32>
    %c0_11 = arith.constant 0 : index
    %c0_12 = arith.constant 0 : index
    %16 = vector.load %arg6[%c0_11, %c0_12] : memref<32x32xf32, #tpu.memory_space<vmem>>, vector<32x32xf32>
    %cst_13 = arith.constant dense<0.000000e+00> : vector<16x32xf32>
    %17 = tpu.matmul %10, %16, %cst_13 {dimension_numbers = #tpu.dot_dimension_numbers<[1], [0], [0], [1], [0, 0, 1, 1], [], []>} : vector<16x32xf32>, vector<32x32xf32>, vector<16x32xf32> -> vector<16x32xf32>
    %c0_14 = arith.constant 0 : index
    %c0_15 = arith.constant 0 : index
    %18 = vector.load %arg7[%c0_14, %c0_15] : memref<1x32xf32, #tpu.memory_space<vmem>>, vector<1x32xf32>
    %19 = vector.broadcast %18 : vector<1x32xf32> to vector<16x32xf32>
    %20 = arith.addf %17, %19 : vector<16x32xf32>
    %21 = vector.extract_strided_slice %15 {offsets = [0, 0], sizes = [16, 32], strides = [1, 1]} : vector<16x64xf32> to vector<16x32xf32>
    %22 = vector.extract_strided_slice %15 {offsets = [0, 32], sizes = [16, 32], strides = [1, 1]} : vector<16x64xf32> to vector<16x32xf32>
    %23 = vector.shape_cast %21 : vector<16x32xf32> to vector<2x8x32xf32>
    %24 = vector.extract_strided_slice %23 {offsets = [0, 0, 0], sizes = [2, 8, 8], strides = [1, 1, 1]} : vector<2x8x32xf32> to vector<2x8x8xf32>
    %25 = vector.extract_strided_slice %23 {offsets = [0, 0, 8], sizes = [2, 8, 8], strides = [1, 1, 1]} : vector<2x8x32xf32> to vector<2x8x8xf32>
    %26 = vector.extract_strided_slice %23 {offsets = [0, 0, 16], sizes = [2, 8, 8], strides = [1, 1, 1]} : vector<2x8x32xf32> to vector<2x8x8xf32>
    %27 = vector.extract_strided_slice %23 {offsets = [0, 0, 24], sizes = [2, 8, 8], strides = [1, 1, 1]} : vector<2x8x32xf32> to vector<2x8x8xf32>
    %28 = vector.shape_cast %24 : vector<2x8x8xf32> to vector<1x2x8x8xf32>
    %29 = vector.shape_cast %25 : vector<2x8x8xf32> to vector<1x2x8x8xf32>
    %30 = vector.shape_cast %26 : vector<2x8x8xf32> to vector<1x2x8x8xf32>
    %31 = vector.shape_cast %27 : vector<2x8x8xf32> to vector<1x2x8x8xf32>
    %32 = tpu.concatenate %28, %29, %30, %31 in 0 : vector<1x2x8x8xf32>, vector<1x2x8x8xf32>, vector<1x2x8x8xf32>, vector<1x2x8x8xf32> -> vector<4x2x8x8xf32>
    %33 = vector.shape_cast %32 : vector<4x2x8x8xf32> to vector<8x8x8xf32>
    %34 = vector.shape_cast %20 : vector<16x32xf32> to vector<2x8x32xf32>
    %35 = vector.extract_strided_slice %34 {offsets = [0, 0, 0], sizes = [2, 8, 8], strides = [1, 1, 1]} : vector<2x8x32xf32> to vector<2x8x8xf32>
    %36 = vector.extract_strided_slice %34 {offsets = [0, 0, 8], sizes = [2, 8, 8], strides = [1, 1, 1]} : vector<2x8x32xf32> to vector<2x8x8xf32>
    %37 = vector.extract_strided_slice %34 {offsets = [0, 0, 16], sizes = [2, 8, 8], strides = [1, 1, 1]} : vector<2x8x32xf32> to vector<2x8x8xf32>
    %38 = vector.extract_strided_slice %34 {offsets = [0, 0, 24], sizes = [2, 8, 8], strides = [1, 1, 1]} : vector<2x8x32xf32> to vector<2x8x8xf32>
    %39 = vector.shape_cast %35 : vector<2x8x8xf32> to vector<1x2x8x8xf32>
    %40 = vector.shape_cast %36 : vector<2x8x8xf32> to vector<1x2x8x8xf32>
    %41 = vector.shape_cast %37 : vector<2x8x8xf32> to vector<1x2x8x8xf32>
    %42 = vector.shape_cast %38 : vector<2x8x8xf32> to vector<1x2x8x8xf32>
    %43 = tpu.concatenate %39, %40, %41, %42 in 0 : vector<1x2x8x8xf32>, vector<1x2x8x8xf32>, vector<1x2x8x8xf32>, vector<1x2x8x8xf32> -> vector<4x2x8x8xf32>
    %44 = vector.shape_cast %43 : vector<4x2x8x8xf32> to vector<8x8x8xf32>
    %45 = vector.shape_cast %22 : vector<16x32xf32> to vector<2x8x32xf32>
    %46 = vector.extract_strided_slice %45 {offsets = [0, 0, 0], sizes = [2, 8, 8], strides = [1, 1, 1]} : vector<2x8x32xf32> to vector<2x8x8xf32>
    %47 = vector.extract_strided_slice %45 {offsets = [0, 0, 8], sizes = [2, 8, 8], strides = [1, 1, 1]} : vector<2x8x32xf32> to vector<2x8x8xf32>
    %48 = vector.extract_strided_slice %45 {offsets = [0, 0, 16], sizes = [2, 8, 8], strides = [1, 1, 1]} : vector<2x8x32xf32> to vector<2x8x8xf32>
    %49 = vector.extract_strided_slice %45 {offsets = [0, 0, 24], sizes = [2, 8, 8], strides = [1, 1, 1]} : vector<2x8x32xf32> to vector<2x8x8xf32>
    %50 = vector.shape_cast %46 : vector<2x8x8xf32> to vector<1x2x8x8xf32>
    %51 = vector.shape_cast %47 : vector<2x8x8xf32> to vector<1x2x8x8xf32>
    %52 = vector.shape_cast %48 : vector<2x8x8xf32> to vector<1x2x8x8xf32>
    %53 = vector.shape_cast %49 : vector<2x8x8xf32> to vector<1x2x8x8xf32>
    %54 = tpu.concatenate %50, %51, %52, %53 in 0 : vector<1x2x8x8xf32>, vector<1x2x8x8xf32>, vector<1x2x8x8xf32>, vector<1x2x8x8xf32> -> vector<4x2x8x8xf32>
    %55 = vector.shape_cast %54 : vector<4x2x8x8xf32> to vector<8x8x8xf32>
    "tpu.trace_start"() <{level = 10 : i32, message = "bqd,bkd->bqk"}> : () -> ()
    %cst_16 = arith.constant dense<0.000000e+00> : vector<8x8x8xf32>
    %56 = tpu.matmul %33, %44, %cst_16 {dimension_numbers = #tpu.dot_dimension_numbers<[2], [2], [1], [1], [0, 0, 0, 1, 1, 1], [0], [0]>} : vector<8x8x8xf32>, vector<8x8x8xf32>, vector<8x8x8xf32> -> vector<8x8x8xf32>
    "tpu.trace_stop"() : () -> ()
    %cst_17 = arith.constant 0.353553385 : f32
    %57 = vector.broadcast %cst_17 : f32 to vector<8x8x8xf32>
    %58 = arith.mulf %56, %57 : vector<8x8x8xf32>
    %cst_18 = arith.constant dense<0xFF800000> : vector<8x8xf32>
    %59 = vector.multi_reduction <maximumf>, %58, %cst_18 [2] : vector<8x8x8xf32> to vector<8x8xf32>
    %60 = vector.shape_cast %59 : vector<8x8xf32> to vector<8x8x1xf32>
    %61 = vector.broadcast %60 : vector<8x8x1xf32> to vector<8x8x8xf32>
    %62 = arith.subf %58, %61 : vector<8x8x8xf32>
    %63 = math.exp %62 : vector<8x8x8xf32>
    %cst_19 = arith.constant dense<0.000000e+00> : vector<8x8xf32>
    %64 = vector.multi_reduction <add>, %63, %cst_19 [2] : vector<8x8x8xf32> to vector<8x8xf32>
    %65 = vector.shape_cast %64 : vector<8x8xf32> to vector<8x8x1xf32>
    %66 = tpu.reciprocal %65 : vector<8x8x1xf32> -> vector<8x8x1xf32>
    %67 = vector.broadcast %66 : vector<8x8x1xf32> to vector<8x8x8xf32>
    %68 = arith.mulf %63, %67 : vector<8x8x8xf32>
    "tpu.trace_start"() <{level = 10 : i32, message = "bqk,bkd->bqd"}> : () -> ()
    %cst_20 = arith.constant dense<0.000000e+00> : vector<8x8x8xf32>
    %69 = tpu.matmul %68, %55, %cst_20 {dimension_numbers = #tpu.dot_dimension_numbers<[2], [1], [1], [2], [0, 0, 0, 1, 1, 2], [0], [0]>} : vector<8x8x8xf32>, vector<8x8x8xf32>, vector<8x8x8xf32> -> vector<8x8x8xf32>
    "tpu.trace_stop"() : () -> ()
    %70 = vector.shape_cast %69 : vector<8x8x8xf32> to vector<4x2x8x8xf32>
    %71 = vector.extract_strided_slice %70 {offsets = [0, 0, 0, 0], sizes = [1, 2, 8, 8], strides = [1, 1, 1, 1]} : vector<4x2x8x8xf32> to vector<1x2x8x8xf32>
    %72 = vector.shape_cast %71 : vector<1x2x8x8xf32> to vector<2x8x8xf32>
    %73 = vector.extract_strided_slice %70 {offsets = [1, 0, 0, 0], sizes = [1, 2, 8, 8], strides = [1, 1, 1, 1]} : vector<4x2x8x8xf32> to vector<1x2x8x8xf32>
    %74 = vector.shape_cast %73 : vector<1x2x8x8xf32> to vector<2x8x8xf32>
    %75 = vector.extract_strided_slice %70 {offsets = [2, 0, 0, 0], sizes = [1, 2, 8, 8], strides = [1, 1, 1, 1]} : vector<4x2x8x8xf32> to vector<1x2x8x8xf32>
    %76 = vector.shape_cast %75 : vector<1x2x8x8xf32> to vector<2x8x8xf32>
    %77 = vector.extract_strided_slice %70 {offsets = [3, 0, 0, 0], sizes = [1, 2, 8, 8], strides = [1, 1, 1, 1]} : vector<4x2x8x8xf32> to vector<1x2x8x8xf32>
    %78 = vector.shape_cast %77 : vector<1x2x8x8xf32> to vector<2x8x8xf32>
    %79 = tpu.concatenate %72, %74, %76, %78 in 2 : vector<2x8x8xf32>, vector<2x8x8xf32>, vector<2x8x8xf32>, vector<2x8x8xf32> -> vector<2x8x32xf32>
    %80 = vector.shape_cast %79 : vector<2x8x32xf32> to vector<16x32xf32>
    %c0_21 = arith.constant 0 : index
    %c0_22 = arith.constant 0 : index
    %81 = vector.load %arg8[%c0_21, %c0_22] : memref<32x32xf32, #tpu.memory_space<vmem>>, vector<32x32xf32>
    %cst_23 = arith.constant dense<0.000000e+00> : vector<16x32xf32>
    %82 = tpu.matmul %80, %81, %cst_23 {dimension_numbers = #tpu.dot_dimension_numbers<[1], [0], [0], [1], [0, 0, 1, 1], [], []>} : vector<16x32xf32>, vector<32x32xf32>, vector<16x32xf32> -> vector<16x32xf32>
    %c0_24 = arith.constant 0 : index
    %c0_25 = arith.constant 0 : index
    %83 = vector.load %arg9[%c0_24, %c0_25] : memref<1x32xf32, #tpu.memory_space<vmem>>, vector<1x32xf32>
    %84 = vector.broadcast %83 : vector<1x32xf32> to vector<16x32xf32>
    %85 = arith.addf %82, %84 : vector<16x32xf32>
    %86 = vector.shape_cast %85 : vector<16x32xf32> to vector<2x8x32xf32>
    %c0_26 = arith.constant 0 : index
    %c0_27 = arith.constant 0 : index
    %c0_28 = arith.constant 0 : index
    %87 = vector.load %arg10[%c0_26, %c0_27, %c0_28] : memref<2x8x32xf32, #tpu.memory_space<vmem>>, vector<2x8x32xf32>
    tpu.vector_store %arg10[%c0_26, %c0_27, %c0_28], %86 {strides = array<i32>} : memref<2x8x32xf32, #tpu.memory_space<vmem>>, vector<2x8x32xf32>,
    return
  }
  func.func @transform_0(%arg0: i32) -> (i32, i32) {
    %c0_i32 = arith.constant 0 : i32
    %c0_i32_0 = arith.constant 0 : i32
    return %arg0, %c0_i32 : i32, i32
  }
  func.func @transform_1(%arg0: i32) -> (i32, i32, i32) {
    %c0_i32 = arith.constant 0 : i32
    %c0_i32_0 = arith.constant 0 : i32
    %c0_i32_1 = arith.constant 0 : i32
    return %arg0, %c0_i32, %c0_i32_0 : i32, i32, i32
  }
  func.func @transform_2(%arg0: i32) -> (i32, i32, i32) {
    %c0_i32 = arith.constant 0 : i32
    %c0_i32_0 = arith.constant 0 : i32
    %c0_i32_1 = arith.constant 0 : i32
    return %arg0, %c0_i32, %c0_i32_0 : i32, i32, i32
  }
  func.func @transform_3(%arg0: i32) -> (i32, i32) {
    %c0_i32 = arith.constant 0 : i32
    %c0_i32_0 = arith.constant 0 : i32
    %c0_i32_1 = arith.constant 0 : i32
    return %c0_i32, %c0_i32_0 : i32, i32
  }
  func.func @transform_4(%arg0: i32) -> (i32, i32) {
    %c0_i32 = arith.constant 0 : i32
    %c0_i32_0 = arith.constant 0 : i32
    %c0_i32_1 = arith.constant 0 : i32
    return %c0_i32, %c0_i32_0 : i32, i32
  }
  func.func @transform_5(%arg0: i32) -> (i32, i32) {
    %c0_i32 = arith.constant 0 : i32
    %c0_i32_0 = arith.constant 0 : i32
    %c0_i32_1 = arith.constant 0 : i32
    return %c0_i32, %c0_i32_0 : i32, i32
  }
  func.func @transform_6(%arg0: i32) -> (i32, i32) {
    %c0_i32 = arith.constant 0 : i32
    %c0_i32_0 = arith.constant 0 : i32
    %c0_i32_1 = arith.constant 0 : i32
    return %c0_i32, %c0_i32_0 : i32, i32
  }
  func.func @transform_7(%arg0: i32) -> (i32, i32) {
    %c0_i32 = arith.constant 0 : i32
    %c0_i32_0 = arith.constant 0 : i32
    %c0_i32_1 = arith.constant 0 : i32
    return %c0_i32, %c0_i32_0 : i32, i32
  }
  func.func @transform_8(%arg0: i32) -> (i32, i32) {
    %c0_i32 = arith.constant 0 : i32
    %c0_i32_0 = arith.constant 0 : i32
    %c0_i32_1 = arith.constant 0 : i32
    return %c0_i32, %c0_i32_0 : i32, i32
  }
  func.func @transform_9(%arg0: i32) -> (i32, i32, i32) {
    %c0_i32 = arith.constant 0 : i32
    %c0_i32_0 = arith.constant 0 : i32
    %c0_i32_1 = arith.constant 0 : i32
    return %arg0, %c0_i32, %c0_i32_0 : i32, i32, i32
  }
}

module attributes {stable_mosaic.version = 11 : i64} {
  func.func @kernel(%arg0: i32, %arg1: memref<2x32xf32, #tpu.memory_space<vmem>>, %arg2: memref<2x8x32xf32, #tpu.memory_space<vmem>>, %arg3: memref<2x8x32xf32, #tpu.memory_space<vmem>>, %arg4: memref<32x64xf32, #tpu.memory_space<vmem>>, %arg5: memref<1x64xf32, #tpu.memory_space<vmem>>, %arg6: memref<32x32xf32, #tpu.memory_space<vmem>>, %arg7: memref<1x32xf32, #tpu.memory_space<vmem>>, %arg8: memref<32x32xf32, #tpu.memory_space<vmem>>, %arg9: memref<1x32xf32, #tpu.memory_space<vmem>>, %arg10: memref<2x8x32xf32, #tpu.memory_space<vmem>>) attributes {dimension_semantics = [#tpu.dimension_semantics<parallel>], iteration_bounds = array<i64: 1>, scalar_prefetch = 0 : i64, scratch_operands = 0 : i64, tpu.core_type = #tpu.core_type<tc>, window_params = [{transform_indices = @transform_0, window_bounds = array<i64: 2, 32>}, {transform_indices = @transform_1, window_bounds = array<i64: 2, 8, 32>}, {transform_indices = @transform_2, window_bounds = array<i64: 2, 8, 32>}, {pipeline_mode = #tpu.pipeline_mode<synchronous>, transform_indices = @transform_3, window_bounds = array<i64: 32, 64>}, {pipeline_mode = #tpu.pipeline_mode<synchronous>, transform_indices = @transform_4, window_bounds = array<i64: 1, 64>}, {pipeline_mode = #tpu.pipeline_mode<synchronous>, transform_indices = @transform_5, window_bounds = array<i64: 32, 32>}, {pipeline_mode = #tpu.pipeline_mode<synchronous>, transform_indices = @transform_6, window_bounds = array<i64: 1, 32>}, {pipeline_mode = #tpu.pipeline_mode<synchronous>, transform_indices = @transform_7, window_bounds = array<i64: 32, 32>}, {pipeline_mode = #tpu.pipeline_mode<synchronous>, transform_indices = @transform_8, window_bounds = array<i64: 1, 32>}, {transform_indices = @transform_9, window_bounds = array<i64: 2, 8, 32>}]} {
    %c0 = arith.constant 0 : index
    %c0_0 = arith.constant 0 : index
    %0 = vector.load %arg1[%c0, %c0_0] : memref<2x32xf32, #tpu.memory_space<vmem>>, vector<2x32xf32>
    %c0_1 = arith.constant 0 : index
    %c0_2 = arith.constant 0 : index
    %c0_3 = arith.constant 0 : index
    %1 = vector.load %arg2[%c0_1, %c0_2, %c0_3] : memref<2x8x32xf32, #tpu.memory_space<vmem>>, vector<2x8x32xf32>
    %2 = vector.shape_cast %0 : vector<2x32xf32> to vector<2x1x32xf32>
    %3 = vector.broadcast %2 : vector<2x1x32xf32> to vector<2x8x32xf32>
    %4 = arith.addf %1, %3 : vector<2x8x32xf32>
    %c0_4 = arith.constant 0 : index
    %c0_5 = arith.constant 0 : index
    %c0_6 = arith.constant 0 : index
    %5 = vector.load %arg3[%c0_4, %c0_5, %c0_6] : memref<2x8x32xf32, #tpu.memory_space<vmem>>, vector<2x8x32xf32>
    %6 = vector.shape_cast %0 : vector<2x32xf32> to vector<2x1x32xf32>
    %7 = vector.broadcast %6 : vector<2x1x32xf32> to vector<2x8x32xf32>
    %8 = arith.addf %5, %7 : vector<2x8x32xf32>
    %9 = vector.shape_cast %4 : vector<2x8x32xf32> to vector<16x32xf32>
    %10 = vector.shape_cast %8 : vector<2x8x32xf32> to vector<16x32xf32>
    %c0_7 = arith.constant 0 : index
    %c0_8 = arith.constant 0 : index
    %11 = vector.load %arg4[%c0_7, %c0_8] : memref<32x64xf32, #tpu.memory_space<vmem>>, vector<32x64xf32>
    %cst = arith.constant dense<0.000000e+00> : vector<16x64xf32>
    %12 = tpu.matmul %9, %11, %cst {dimension_numbers = #tpu.dot_dimension_numbers<[1], [0], [0], [1], [0, 0, 1, 1], [], []>} : vector<16x32xf32>, vector<32x64xf32>, vector<16x64xf32> -> vector<16x64xf32>
    %c0_9 = arith.constant 0 : index
    %c0_10 = arith.constant 0 : index
    %13 = vector.load %arg5[%c0_9, %c0_10] : memref<1x64xf32, #tpu.memory_space<vmem>>, vector<1x64xf32>
    %14 = vector.broadcast %13 : vector<1x64xf32> to vector<16x64xf32>
    %15 = arith.addf %12, %14 : vector<16x64xf32>
    %c0_11 = arith.constant 0 : index
    %c0_12 = arith.constant 0 : index
    %16 = vector.load %arg6[%c0_11, %c0_12] : memref<32x32xf32, #tpu.memory_space<vmem>>, vector<32x32xf32>
    %cst_13 = arith.constant dense<0.000000e+00> : vector<16x32xf32>
    %17 = tpu.matmul %10, %16, %cst_13 {dimension_numbers = #tpu.dot_dimension_numbers<[1], [0], [0], [1], [0, 0, 1, 1], [], []>} : vector<16x32xf32>, vector<32x32xf32>, vector<16x32xf32> -> vector<16x32xf32>
    %c0_14 = arith.constant 0 : index
    %c0_15 = arith.constant 0 : index
    %18 = vector.load %arg7[%c0_14, %c0_15] : memref<1x32xf32, #tpu.memory_space<vmem>>, vector<1x32xf32>
    %19 = vector.broadcast %18 : vector<1x32xf32> to vector<16x32xf32>
    %20 = arith.addf %17, %19 : vector<16x32xf32>
    %21 = vector.extract_strided_slice %15 {offsets = [0, 0], sizes = [16, 32], strides = [1, 1]} : vector<16x64xf32> to vector<16x32xf32>
    %22 = vector.extract_strided_slice %15 {offsets = [0, 32], sizes = [16, 32], strides = [1, 1]} : vector<16x64xf32> to vector<16x32xf32>
    %23 = vector.shape_cast %21 : vector<16x32xf32> to vector<2x8x32xf32>
    %24 = vector.extract_strided_slice %23 {offsets = [0, 0, 0], sizes = [2, 8, 8], strides = [1, 1, 1]} : vector<2x8x32xf32> to vector<2x8x8xf32>
    %25 = vector.extract_strided_slice %23 {offsets = [0, 0, 8], sizes = [2, 8, 8], strides = [1, 1, 1]} : vector<2x8x32xf32> to vector<2x8x8xf32>
    %26 = vector.extract_strided_slice %23 {offsets = [0, 0, 16], sizes = [2, 8, 8], strides = [1, 1, 1]} : vector<2x8x32xf32> to vector<2x8x8xf32>
    %27 = vector.extract_strided_slice %23 {offsets = [0, 0, 24], sizes = [2, 8, 8], strides = [1, 1, 1]} : vector<2x8x32xf32> to vector<2x8x8xf32>
    %28 = vector.shape_cast %24 : vector<2x8x8xf32> to vector<1x2x8x8xf32>
    %29 = vector.shape_cast %25 : vector<2x8x8xf32> to vector<1x2x8x8xf32>
    %30 = vector.shape_cast %26 : vector<2x8x8xf32> to vector<1x2x8x8xf32>
    %31 = vector.shape_cast %27 : vector<2x8x8xf32> to vector<1x2x8x8xf32>
    %32 = tpu.concatenate %28, %29, %30, %31 in 0 : vector<1x2x8x8xf32>, vector<1x2x8x8xf32>, vector<1x2x8x8xf32>, vector<1x2x8x8xf32> -> vector<4x2x8x8xf32>
    %33 = vector.shape_cast %32 : vector<4x2x8x8xf32> to vector<8x8x8xf32>
    %34 = vector.shape_cast %20 : vector<16x32xf32> to vector<2x8x32xf32>
    %35 = vector.extract_strided_slice %34 {offsets = [0, 0, 0], sizes = [2, 8, 8], strides = [1, 1, 1]} : vector<2x8x32xf32> to vector<2x8x8xf32>
    %36 = vector.extract_strided_slice %34 {offsets = [0, 0, 8], sizes = [2, 8, 8], strides = [1, 1, 1]} : vector<2x8x32xf32> to vector<2x8x8xf32>
    %37 = vector.extract_strided_slice %34 {offsets = [0, 0, 16], sizes = [2, 8, 8], strides = [1, 1, 1]} : vector<2x8x32xf32> to vector<2x8x8xf32>
    %38 = vector.extract_strided_slice %34 {offsets = [0, 0, 24], sizes = [2, 8, 8], strides = [1, 1, 1]} : vector<2x8x32xf32> to vector<2x8x8xf32>
    %39 = vector.shape_cast %35 : vector<2x8x8xf32> to vector<1x2x8x8xf32>
    %40 = vector.shape_cast %36 : vector<2x8x8xf32> to vector<1x2x8x8xf32>
    %41 = vector.shape_cast %37 : vector<2x8x8xf32> to vector<1x2x8x8xf32>
    %42 = vector.shape_cast %38 : vector<2x8x8xf32> to vector<1x2x8x8xf32>
    %43 = tpu.concatenate %39, %40, %41, %42 in 0 : vector<1x2x8x8xf32>, vector<1x2x8x8xf32>, vector<1x2x8x8xf32>, vector<1x2x8x8xf32> -> vector<4x2x8x8xf32>
    %44 = vector.shape_cast %43 : vector<4x2x8x8xf32> to vector<8x8x8xf32>
    %45 = vector.shape_cast %22 : vector<16x32xf32> to vector<2x8x32xf32>
    %46 = vector.extract_strided_slice %45 {offsets = [0, 0, 0], sizes = [2, 8, 8], strides = [1, 1, 1]} : vector<2x8x32xf32> to vector<2x8x8xf32>
    %47 = vector.extract_strided_slice %45 {offsets = [0, 0, 8], sizes = [2, 8, 8], strides = [1, 1, 1]} : vector<2x8x32xf32> to vector<2x8x8xf32>
    %48 = vector.extract_strided_slice %45 {offsets = [0, 0, 16], sizes = [2, 8, 8], strides = [1, 1, 1]} : vector<2x8x32xf32> to vector<2x8x8xf32>
    %49 = vector.extract_strided_slice %45 {offsets = [0, 0, 24], sizes = [2, 8, 8], strides = [1, 1, 1]} : vector<2x8x32xf32> to vector<2x8x8xf32>
    %50 = vector.shape_cast %46 : vector<2x8x8xf32> to vector<1x2x8x8xf32>
    %51 = vector.shape_cast %47 : vector<2x8x8xf32> to vector<1x2x8x8xf32>
    %52 = vector.shape_cast %48 : vector<2x8x8xf32> to vector<1x2x8x8xf32>
    %53 = vector.shape_cast %49 : vector<2x8x8xf32> to vector<1x2x8x8xf32>
    %54 = tpu.concatenate %50, %51, %52, %53 in 0 : vector<1x2x8x8xf32>, vector<1x2x8x8xf32>, vector<1x2x8x8xf32>, vector<1x2x8x8xf32> -> vector<4x2x8x8xf32>
    %55 = vector.shape_cast %54 : vector<4x2x8x8xf32> to vector<8x8x8xf32>
    "tpu.trace_start"() <{level = 10 : i32, message = "bqd,bkd->bqk"}> : () -> ()
    %cst_16 = arith.constant dense<0.000000e+00> : vector<8x8x8xf32>
    %56 = tpu.matmul %33, %44, %cst_16 {dimension_numbers = #tpu.dot_dimension_numbers<[2], [2], [1], [1], [0, 0, 0, 1, 1, 1], [0], [0]>} : vector<8x8x8xf32>, vector<8x8x8xf32>, vector<8x8x8xf32> -> vector<8x8x8xf32>
    "tpu.trace_stop"() : () -> ()
    %cst_17 = arith.constant 0.353553385 : f32
    %57 = vector.broadcast %cst_17 : f32 to vector<8x8x8xf32>
    %58 = arith.mulf %56, %57 : vector<8x8x8xf32>
    %cst_18 = arith.constant dense<0xFF800000> : vector<8x8xf32>
    %59 = vector.multi_reduction <maximumf>, %58, %cst_18 [2] : vector<8x8x8xf32> to vector<8x8xf32>
    %60 = vector.shape_cast %59 : vector<8x8xf32> to vector<8x8x1xf32>
    %61 = vector.broadcast %60 : vector<8x8x1xf32> to vector<8x8x8xf32>
    %62 = arith.subf %58, %61 : vector<8x8x8xf32>
    %63 = math.exp %62 : vector<8x8x8xf32>
    %cst_19 = arith.constant dense<0.000000e+00> : vector<8x8xf32>
    %64 = vector.multi_reduction <add>, %63, %cst_19 [2] : vector<8x8x8xf32> to vector<8x8xf32>
    %65 = vector.shape_cast %64 : vector<8x8xf32> to vector<8x8x1xf32>
    %66 = tpu.reciprocal %65 : vector<8x8x1xf32> -> vector<8x8x1xf32>
    %67 = vector.broadcast %66 : vector<8x8x1xf32> to vector<8x8x8xf32>
    %68 = arith.mulf %63, %67 : vector<8x8x8xf32>
    "tpu.trace_start"() <{level = 10 : i32, message = "bqk,bkd->bqd"}> : () -> ()
    %cst_20 = arith.constant dense<0.000000e+00> : vector<8x8x8xf32>
    %69 = tpu.matmul %68, %55, %cst_20 {dimension_numbers = #tpu.dot_dimension_numbers<[2], [1], [1], [2], [0, 0, 0, 1, 1, 2], [0], [0]>} : vector<8x8x8xf32>, vector<8x8x8xf32>, vector<8x8x8xf32> -> vector<8x8x8xf32>
    "tpu.trace_stop"() : () -> ()
    %70 = vector.shape_cast %69 : vector<8x8x8xf32> to vector<4x2x8x8xf32>
    %71 = vector.extract_strided_slice %70 {offsets = [0, 0, 0, 0], sizes = [1, 2, 8, 8], strides = [1, 1, 1, 1]} : vector<4x2x8x8xf32> to vector<1x2x8x8xf32>
    %72 = vector.shape_cast %71 : vector<1x2x8x8xf32> to vector<2x8x8xf32>
    %73 = vector.extract_strided_slice %70 {offsets = [1, 0, 0, 0], sizes = [1, 2, 8, 8], strides = [1, 1, 1, 1]} : vector<4x2x8x8xf32> to vector<1x2x8x8xf32>
    %74 = vector.shape_cast %73 : vector<1x2x8x8xf32> to vector<2x8x8xf32>
    %75 = vector.extract_strided_slice %70 {offsets = [2, 0, 0, 0], sizes = [1, 2, 8, 8], strides = [1, 1, 1, 1]} : vector<4x2x8x8xf32> to vector<1x2x8x8xf32>
    %76 = vector.shape_cast %75 : vector<1x2x8x8xf32> to vector<2x8x8xf32>
    %77 = vector.extract_strided_slice %70 {offsets = [3, 0, 0, 0], sizes = [1, 2, 8, 8], strides = [1, 1, 1, 1]} : vector<4x2x8x8xf32> to vector<1x2x8x8xf32>
    %78 = vector.shape_cast %77 : vector<1x2x8x8xf32> to vector<2x8x8xf32>
    %79 = tpu.concatenate %72, %74, %76, %78 in 2 : vector<2x8x8xf32>, vector<2x8x8xf32>, vector<2x8x8xf32>, vector<2x8x8xf32> -> vector<2x8x32xf32>
    %80 = vector.shape_cast %79 : vector<2x8x32xf32> to vector<16x32xf32>
    %c0_21 = arith.constant 0 : index
    %c0_22 = arith.constant 0 : index
    %81 = vector.load %arg8[%c0_21, %c0_22] : memref<32x32xf32, #tpu.memory_space<vmem>>, vector<32x32xf32>
    %cst_23 = arith.constant dense<0.000000e+00> : vector<16x32xf32>
    %82 = tpu.matmul %80, %81, %cst_23 {dimension_numbers = #tpu.dot_dimension_numbers<[1], [0], [0], [1], [0, 0, 1, 1], [], []>} : vector<16x32xf32>, vector<32x32xf32>, vector<16x32xf32> -> vector<16x32xf32>
    %c0_24 = arith.constant 0 : index
    %c0_25 = arith.constant 0 : index
    %83 = vector.load %arg9[%c0_24, %c0_25] : memref<1x32xf32, #tpu.memory_space<vmem>>, vector<1x32xf32>
    %84 = vector.broadcast %83 : vector<1x32xf32> to vector<16x32xf32>
    %85 = arith.addf %82, %84 : vector<16x32xf32>
    %86 = vector.shape_cast %85 : vector<16x32xf32> to vector<2x8x32xf32>
    %c0_26 = arith.constant 0 : index
    %c0_27 = arith.constant 0 : index
    %c0_28 = arith.constant 0 : index
    %87 = vector.load %arg10[%c0_26, %c0_27, %c0_28] : memref<2x8x32xf32, #tpu.memory_space<vmem>>, vector<2x8x32xf32>
    tpu.vector_store %arg10[%c0_26, %c0_27, %c0_28], %86 {strides = array<i32>} : memref<2x8x32xf32, #tpu.memory_space<vmem>>, vector<2x8x32xf32>,
    return
  }
  func.func @transform_0(%arg0: i32) -> (i32, i32) {
    %c0_i32 = arith.constant 0 : i32
    %c0_i32_0 = arith.constant 0 : i32
    return %arg0, %c0_i32 : i32, i32
  }
  func.func @transform_1(%arg0: i32) -> (i32, i32, i32) {
    %c0_i32 = arith.constant 0 : i32
    %c0_i32_0 = arith.constant 0 : i32
    %c0_i32_1 = arith.constant 0 : i32
    return %arg0, %c0_i32, %c0_i32_0 : i32, i32, i32
  }
  func.func @transform_2(%arg0: i32) -> (i32, i32, i32) {
    %c0_i32 = arith.constant 0 : i32
    %c0_i32_0 = arith.constant 0 : i32
    %c0_i32_1 = arith.constant 0 : i32
    return %arg0, %c0_i32, %c0_i32_0 : i32, i32, i32
  }
  func.func @transform_3(%arg0: i32) -> (i32, i32) {
    %c0_i32 = arith.constant 0 : i32
    %c0_i32_0 = arith.constant 0 : i32
    %c0_i32_1 = arith.constant 0 : i32
    return %c0_i32, %c0_i32_0 : i32, i32
  }
  func.func @transform_4(%arg0: i32) -> (i32, i32) {
    %c0_i32 = arith.constant 0 : i32
    %c0_i32_0 = arith.constant 0 : i32
    %c0_i32_1 = arith.constant 0 : i32
    return %c0_i32, %c0_i32_0 : i32, i32
  }
  func.func @transform_5(%arg0: i32) -> (i32, i32) {
    %c0_i32 = arith.constant 0 : i32
    %c0_i32_0 = arith.constant 0 : i32
    %c0_i32_1 = arith.constant 0 : i32
    return %c0_i32, %c0_i32_0 : i32, i32
  }
  func.func @transform_6(%arg0: i32) -> (i32, i32) {
    %c0_i32 = arith.constant 0 : i32
    %c0_i32_0 = arith.constant 0 : i32
    %c0_i32_1 = arith.constant 0 : i32
    return %c0_i32, %c0_i32_0 : i32, i32
  }
  func.func @transform_7(%arg0: i32) -> (i32, i32) {
    %c0_i32 = arith.constant 0 : i32
    %c0_i32_0 = arith.constant 0 : i32
    %c0_i32_1 = arith.constant 0 : i32
    return %c0_i32, %c0_i32_0 : i32, i32
  }
  func.func @transform_8(%arg0: i32) -> (i32, i32) {
    %c0_i32 = arith.constant 0 : i32
    %c0_i32_0 = arith.constant 0 : i32
    %c0_i32_1 = arith.constant 0 : i32
    return %c0_i32, %c0_i32_0 : i32, i32
  }
  func.func @transform_9(%arg0: i32) -> (i32, i32, i32) {
    %c0_i32 = arith.constant 0 : i32
    %c0_i32_0 = arith.constant 0 : i32
    %c0_i32_1 = arith.constant 0 : i32
    return %arg0, %c0_i32, %c0_i32_0 : i32, i32, i32
  }
}

</mosaic_0001>

<bundles_post_ra>
// kernel: tpu_custom_call.1
= control target key start
LH: loop header
LB: loop body
LE: loop exit
PB: predicated region body
PF: predicated region fallthrough
CT: control target
= control target key end

     0   :  { %14 = vsyncpa [#allocation3], 0  ;;  %s2482_s0 = inlined_call_operand.hbm [shape: f32[2,32], index: 0, kind: input, shape index: {}]   ;;  %s2483_s1 = inlined_call_operand.hbm [shape: f32[2,8,32], index: 1, kind: input, shape index: {}]   ;;  %s2484_s2 = inlined_call_operand.hbm [shape: f32[2,8,32], index: 2, kind: input, shape index: {}]   ;;  %s2485_s3 = inlined_call_operand.hbm [shape: f32[32,64], index: 3, kind: input, shape index: {}]   ;;  %s2486_s4 = inlined_call_operand.vmem [shape: f32[1,64], index: 4, kind: input, shape index: {}]   ;;  %s2487_s5 = inlined_call_operand.hbm [shape: f32[32,32], index: 5, kind: input, shape index: {}]   ;;  %s2488_s6 = inlined_call_operand.vmem [shape: f32[1,32], index: 6, kind: input, shape index: {}]   ;;  %s2489_s7 = inlined_call_operand.hbm [shape: f32[32,32], index: 7, kind: input, shape index: {}]   ;;  %s2490_s8 = inlined_call_operand.vmem [shape: f32[1,32], index: 8, kind: input, shape index: {}]   ;;  %s2491_s9 = inlined_call_operand.hbm [shape: f32[2,8,32], index: 9, kind: output, shape index: {}]  }
   0x1   :  { %15 = vsyncpa [#allocation6], 0 }
   0x2   :  { %16 = vsyncpa [#allocation9], 0 }
   0x3   :  { %17 = vsyncpa [#allocation12], 0 }
   0x4   :  { %18 = vsyncpa [#allocation4], 0  ;;  %s2208_s30 = smov [#allocation5]  }
   0x5   :  { %s34_s10 = sshll.u32 %s2208_s30, 4  ;;  %s35_s10 = int_to_ptr.vmem [resolvable:$true] %s34_s10 }
   0x6   :  { %s2066_s11 = scalar_lea.vmem %s35_s10, 256  ;;  %p2071_p1 = scmp.lt.s32.totalorder %s35_s10, %s35_s10 }
   0x7   :  { %p2067_p0 = scmp.ne.s32.totalorder %s35_s10, %s2066_s11  ;;  %p2072_p2 = scmp.lt.s32.totalorder %s2066_s11, %s2066_s11 }
   0x9   :  { %p2073_p3 = por %p2072_p2, %p2071_p1 }
   0xb   :  { %p2074_p4 = pnand %p2073_p3, %p2067_p0 }
   0xd   :  { %2077 = shalt.err (!%p2074_p4)
}
   0xe   :  { %s2209_s12 = smov 128   ;;  %s2210_s13 = smov 8  }
   0xf   :  { %40 = dma.hbm_to_vmem [thread:$0]  %s2483_s1, 256, %s35_s10, [#allocation6], %s2209_s12, %s2209_s12, %s2210_s13  }
  0x10   :  { %s2211_s16 = smov [#allocation8]   ;;  %s2212_s18 = smov [#allocation2]  }
  0x11   :  { %s58_s17 = sshll.u32 %s2211_s16, 4  ;;  %s25_s19 = sshll.u32 %s2212_s18, 4  ;;  %s59_s17 = int_to_ptr.vmem [resolvable:$true] %s58_s17  ;;  %s26_s19 = int_to_ptr.vmem [resolvable:$true] %s25_s19 }
  0x12   :  { %s2086_s20 = scalar_lea.vmem %s59_s17, 512  ;;  %p2091_p6 = scmp.lt.s32.totalorder %s59_s17, %s59_s17 }
  0x13   :  { %p2087_p5 = scmp.ne.s32.totalorder %s59_s17, %s2086_s20  ;;  %p2092_p7 = scmp.lt.s32.totalorder %s2086_s20, %s2086_s20 }
  0x15   :  { %p2093_p8 = por %p2092_p7, %p2091_p6 }
  0x17   :  { %p2094_p9 = pnand %p2093_p8, %p2087_p5 }
  0x19   :  { %2097 = shalt.err (!%p2094_p9)
}
  0x1a   :  { %64 = dma.hbm_to_vmem [thread:$0]  %s2485_s3, 512, %s59_s17, [#allocation9], %s2209_s12, %s2209_s12, %s2210_s13  }
  0x1b   :  { %s2106_s1 = scalar_lea.vmem %s26_s19, 32  ;;  %p2111_p11 = scmp.lt.s32.totalorder %s26_s19, %s26_s19 }
  0x1c   :  { %p2107_p10 = scmp.ne.s32.totalorder %s26_s19, %s2106_s1  ;;  %p2112_p12 = scmp.lt.s32.totalorder %s2106_s1, %s2106_s1 }
  0x1e   :  { %p2113_p13 = por %p2112_p12, %p2111_p11 }
  0x20   :  { %p2114_p0 = pnand %p2113_p13, %p2107_p10 }
  0x22   :  { %2117 = shalt.err (!%p2114_p0)
}
  0x23   :  { %28 = dma.hbm_to_vmem [thread:$0]  %s2482_s0, 32, %s26_s19, [#allocation3]  }
  0x24   :  { %s2213_s25 = smov [#allocation7]   ;;  %s2214_s27 = smov [#allocation10]  }
  0x25   :  { %s46_s26 = sshll.u32 %s2213_s25, 4  ;;  %s72_s28 = sshll.u32 %s2214_s27, 4  ;;  %s47_s26 = int_to_ptr.vmem [resolvable:$true] %s46_s26  ;;  %s73_s28 = int_to_ptr.vmem [resolvable:$true] %s72_s28 }
  0x26   :  { %s2126_s29 = scalar_lea.vmem %s47_s26, 256  ;;  %p2131_p2 = scmp.lt.s32.totalorder %s47_s26, %s47_s26 }
  0x27   :  { %p2127_p1 = scmp.ne.s32.totalorder %s47_s26, %s2126_s29  ;;  %p2132_p3 = scmp.lt.s32.totalorder %s2126_s29, %s2126_s29 }
  0x29   :  { %p2133_p4 = por %p2132_p3, %p2131_p2 }
  0x2b   :  { %p2134_p5 = pnand %p2133_p4, %p2127_p1 }
  0x2d   :  { %2137 = shalt.err (!%p2134_p5)
}
  0x2e   :  { %52 = dma.hbm_to_vmem [thread:$0]  %s2484_s2, 256, %s47_s26, [#allocation6], %s2209_s12, %s2209_s12, %s2210_s13  }
  0x2f   :  { %s2146_s0 = scalar_lea.vmem %s73_s28, 512  ;;  %p2151_p7 = scmp.lt.s32.totalorder %s73_s28, %s73_s28 }
  0x30   :  { %p2147_p6 = scmp.ne.s32.totalorder %s73_s28, %s2146_s0  ;;  %p2152_p8 = scmp.lt.s32.totalorder %s2146_s0, %s2146_s0 }
  0x32   :  { %p2153_p9 = por %p2152_p8, %p2151_p7 }
  0x34   :  { %p2154_p10 = pnand %p2153_p9, %p2147_p6 }
  0x36   :  { %2157 = shalt.err (!%p2154_p10)
}
  0x37   :  { %78 = dma.hbm_to_vmem [thread:$0]  %s2487_s5, 512, %s73_s28, [#allocation9], %s2209_s12, %s2209_s12, %s2210_s13  }
  0x38   :  { %s2215_s14 = smov [#allocation11]  }
  0x39   :  { %s86_s15 = sshll.u32 %s2215_s14, 4  ;;  %s87_s15 = int_to_ptr.vmem [resolvable:$true] %s86_s15 }
  0x3a   :  { %s2166_s16 = scalar_lea.vmem %s87_s15, 512  ;;  %p2171_p12 = scmp.lt.s32.totalorder %s87_s15, %s87_s15 }
  0x3b   :  { %p2167_p11 = scmp.ne.s32.totalorder %s87_s15, %s2166_s16  ;;  %p2172_p13 = scmp.lt.s32.totalorder %s2166_s16, %s2166_s16 }
  0x3d   :  { %p2173_p0 = por %p2172_p13, %p2171_p12 }
  0x3f   :  { %p2174_p1 = pnand %p2173_p0, %p2167_p11 }
  0x41   :  { %2177 = shalt.err (!%p2174_p1)
}
  0x42   :  { %92 = dma.hbm_to_vmem [thread:$0]  %s2489_s7, 512, %s87_s15, [#allocation12], %s2209_s12, %s2209_s12, %s2210_s13  }
  0x43   :  { %2198 = dma.done.wait [#allocation3], 32  }
  0x44   :  { %2199 = vsyncadd [#allocation3], 4294967264 }
  0x45   :  { %2200 = dma.done.wait [#allocation6], 512  }
  0x46   :  { %2201 = vsyncadd [#allocation6], 4294966784 }
  0x47   :  { %2202 = dma.done.wait [#allocation9], 1024  }
  0x48   :  { %2203 = vsyncadd [#allocation9], 4294966272 }
  0x49   :  { %2204 = dma.done.wait [#allocation12], 512  }
  0x4a   :  { %2205 = vsyncadd [#allocation12], 4294966784  ;;  %v128_v0 = vlaneseq  ;;  %v2216_v1 = vmov 1966171168   ;;  %v158_v6 = vld [vmem:[#allocation8 + $0x18] sm:$0xff]  ;;  %v157_v8 = vld [vmem:[#allocation8 + $0x10] sm:$0xff] }
  0x4b   :  { %v126_v2 = vunpack.c.l.s4 %v2216_v1  ;;  %v251_v7 = vld [vmem:[#allocation10 + $0x18] sm:$0xff]  ;;  %1895 = vmatprep.subr.mxu0 %v158_v6  ;;  %v250_v9 = vld [vmem:[#allocation10 + $0x10] sm:$0xff]  ;;  %v156_v11 = vld [vmem:[#allocation8 + $0x8] sm:$0xff]  ;;  %vm166_vm0 = vcmask 261120   ;;  %v2217_v29 = vmov 0.0   ;;  %vm2218_vm1 = vmmov 0  }
  0x4c   :  { %v129_v3 = vshrl.u32 %v128_v0, 7  ;;  %1906 = vmatprep.subr.mxu1 %v251_v7  ;;  %1896 = vmatpush3.msra.mxu0 %v158_v6  ;;  %v249_v12 = vld [vmem:[#allocation10 + $0x8] sm:$0xff]  ;;  %v1811_v13 = vld.sshfl [vmem:[#allocation2] sm:$0x11 pattern:$0x75316420] }
  0x4d   :  { %v127_v4 = vunpack.c.0.s8 %v126_v2  ;;  %1907 = vmatpush3.msra.mxu1 %v251_v7  ;;  %1897 = vmatprep.subr.mxu0 %v157_v8  ;;  %v155_v14 = vld [vmem:[#allocation8] sm:$0xff]  ;;  %v124_v15 = vcombine.high %v1811_v13, %v1811_v13  ;;  %v151_v19 = vld [vmem:[#allocation7] sm:$0xff]  ;;  %v115_v22 = vld [vmem:[#allocation5 + $0x8] sm:$0xff]  ;;  %vm368_vm2 = vcmask 64512   ;;  %s2219_s20 = smov 120   ;;  %s2222_s21 = smov 96  }
  0x4e   :  { %v141_v10 = vsub.s32 0, %v129_v3  ;;  %1908 = vmatprep.subr.mxu1 %v250_v9  ;;  %1898 = vmatpush3.msra.mxu0 %v157_v8  ;;  %v248_v17 = vld [vmem:[#allocation10] sm:$0xff]  ;;  %v152_v23 = vld [vmem:[#allocation7 + $0x8] sm:$0xff]  ;;  %s2223_s22 = smov 16   ;;  %s2224_s1 = smov 24   ;;  %vm1691_vm3 = vcmask 130048  }
  0x4f   :  { %v130_v5 = vsub.s32 %v127_v4, %v129_v3  ;;  %1909 = vmatpush3.msra.mxu1 %v250_v9  ;;  %v114_v18 = vld [vmem:[#allocation5] sm:$0xff]  ;;  %1899 = vmatprep.subr.mxu0 %v156_v11  ;;  %v1812_v30 = vld [vmem:[%s2486_s4] ss:$0 sm:$0xff]  ;;  %s2220_s4 = smov 112   ;;  %vm1694_vm4 = vcmask 195584   ;;  %s2225_s25 = smov [#allocation13]  }
  0x50   :  { %1910 = vmatprep.subr.mxu1 %v249_v12  ;;  %1900 = vmatpush3.msra.mxu0 %v156_v11  ;;  %v1815_v31 = vld [vmem:[%s2488_s6] ss:$0 sm:$0xff]  ;;  %s2221_s6 = smov 104   ;;  %s1796_s26 = sshll.u32 %s2225_s25, 4  ;;  %s1797_s26 = int_to_ptr.vmem [resolvable:$true] %s1796_s26 }
  0x51   :  { %v131_v16 = vrot.slane %v1811_v13, %v130_v5  ;;  %v138_v20 = vrot.slane %v124_v15, %v130_v5  ;;  %1911 = vmatpush3.msra.mxu1 %v249_v12  ;;  %1901 = vmatprep.subr.mxu0 %v155_v14  ;;  %s2178_s27 = scalar_lea.vmem %s1797_s26, 256  ;;  %p2183_p3 = scmp.lt.s32.totalorder %s1797_s26, %s1797_s26 }
  0x52   :  { %1912 = vmatprep.subr.mxu1 %v248_v17  ;;  %1902 = vmatpush3.msra.mxu0 %v155_v14  ;;  %p2179_p2 = scmp.ne.s32.totalorder %s1797_s26, %s2178_s27  ;;  %p2184_p4 = scmp.lt.s32.totalorder %s2178_s27, %s2178_s27 }
  0x53   :  { %v142_v21 = vrot.slane %v131_v16, %v141_v10  ;;  %v146_v24 = vrot.slane %v138_v20, %v141_v10  ;;  %1913 = vmatpush3.msra.mxu1 %v248_v17  ;;  %1927 = vmatprep.subr.mxu0 %v2217_v29 }
  0x54   :  { %1917 = vmatprep.subr.mxu1 %v2217_v29  ;;  %p2185_p5 = por %p2184_p4, %p2183_p3 }
  0x55   :  { %v149_v25 = vadd.f32 %v142_v21, %v114_v18  ;;  %v153_v26 = vadd.f32 %v151_v19, %v142_v21  ;;  %v150_v27 = vadd.f32 %v146_v24, %v115_v22  ;;  %v154_v28 = vadd.f32 %v152_v23, %v146_v24 }
  0x56   :  { %p2186_p6 = pnand %p2185_p5, %p2179_p2 }
  0x57   :  { %1903 = vmatprep.mubr.msk.f32.mxu0 %vm166_vm0, %v149_v25  ;;  %1914 = vmatprep.mubr.msk.f32.mxu1 %vm166_vm0, %v153_v26 }
  0x58   :  { %1904 = vmatmul.mubr.msk.f32.vlgmr.msra.gmra.mxu0 %vm166_vm0, %v150_v27  ;;  %1915 = vmatmul.mubr.msk.f32.vlgmr.msra.gmra.mxu1 %vm166_vm0, %v154_v28 }
  0x59   :  { %1919 = vmatprep.mubr.msk.f32.mxu1 %vm2218_vm1, %v2217_v29  ;;  %1929 = vmatprep.mubr.msk.f32.mxu0 %vm2218_vm1, %v2217_v29 }
 0x118   :  { %v1905_v32 = vpop.f32.mrf.mxu0  ;;  %v1916_v33 = vpop.f32.mrf.mxu1 }
 0x119   :  { %v2325_v34 = vadd.f32 %v1905_v32, %v1812_v30  ;;  %v337_v35 = vadd.f32 %v1916_v33, %v1815_v31 }
 0x11a   :  { %v331_v36 = vpop.f32.mrf.mxu1  ;;  %v239_v37 = vpop.f32.mrf.mxu0 }
 0x11b   :  { %v332_v38 = vadd.f32 %v1815_v31, %v331_v36  ;;  %358 = vrot.lane.b32.xlu0 %v337_v35, %s2219_s20  ;;  %344 = vrot.lane.b32.xlu1 %v2325_v34, %s2219_s20  ;;  %v2329_v39 = vadd.f32 %v1812_v30, %v239_v37 }
 0x11d   :  { %1918 = vmatpush3.xpose.msk.msra.mxu1 %vm368_vm2, %v332_v38 }
 0x11e   :  { %1922 = vmatprep.subr.mxu1 %v2217_v29 }
 0x11f   :  { %356 = vrot.lane.b32.xlu0 %v332_v38, %s2219_s20  ;;  %362 = vrot.lane.b32.xlu1 %v337_v35, %s2220_s4 }
 0x120   :  { %1920 = vmatmul.mubr.msk.f32.vlgmr.msra.gmra.mxu1 %vm368_vm2, %v2329_v39 }
 0x121   :  { %1923 = vmatpush3.xpose.msk.msra.mxu1 %vm368_vm2, %v337_v35  ;;  %1924 = vmatprep.mubr.msk.f32.mxu1 %vm2218_vm1, %v2217_v29 }
 0x122   :  { %1932 = vmatprep.subr.mxu1 %v2217_v29 }
 0x123   :  { %360 = vrot.lane.b32.xlu0 %v332_v38, %s2220_s4  ;;  %342 = vrot.lane.b32.xlu1 %v2329_v39, %s2219_s20 }
 0x124   :  { %1925 = vmatmul.mubr.msk.f32.vlgmr.msra.gmra.mxu1 %vm368_vm2, %v2325_v34 }
 0x125   :  { %1934 = vmatprep.mubr.msk.f32.mxu1 %vm2218_vm1, %v2217_v29 }
 0x127   :  { %346 = vrot.lane.b32.xlu0 %v2329_v39, %s2220_s4  ;;  %348 = vrot.lane.b32.xlu1 %v2325_v34, %s2220_s4 }
 0x12b   :  { %364 = vrot.lane.b32.xlu0 %v332_v38, %s2221_s6  ;;  %366 = vrot.lane.b32.xlu1 %v337_v35, %s2221_s6 }
 0x12f   :  { %350 = vrot.lane.b32.xlu0 %v2329_v39, %s2221_s6  ;;  %352 = vrot.lane.b32.xlu1 %v2325_v34, %s2221_s6 }
 0x18d   :  { %v359_v40 = vpop.permute.xlu0 %358  ;;  %v2347_v41 = vpop.permute.xlu1 %344 }
 0x18e   :  { %1933 = vmatpush3.xpose.msk.msra.mxu1 %vm368_vm2, %v359_v40 }
 0x18f   :  { %1942 = vmatprep.subr.mxu1 %v2217_v29 }
 0x191   :  { %v357_v42 = vpop.permute.xlu0 %356  ;;  %v363_v43 = vpop.permute.xlu1 %362  ;;  %1935 = vmatmul.mubr.msk.f32.vlgmr.msra.gmra.mxu1 %vm368_vm2, %v2347_v41 }
 0x192   :  { %1928 = vmatpush3.xpose.msk.msra.mxu0 %vm368_vm2, %v357_v42  ;;  %1943 = vmatpush3.xpose.msk.msra.mxu1 %vm368_vm2, %v363_v43 }
 0x193   :  { %1937 = vmatprep.subr.mxu0 %v2217_v29  ;;  %1944 = vmatprep.mubr.msk.f32.mxu1 %vm2218_vm1, %v2217_v29 }
 0x194   :  { %1952 = vmatprep.subr.mxu1 %v2217_v29 }
 0x195   :  { %v361_v44 = vpop.permute.xlu0 %360  ;;  %v2359_v45 = vpop.permute.xlu1 %342 }
 0x196   :  { %1930 = vmatmul.mubr.msk.f32.vlgmr.msra.gmra.mxu0 %vm368_vm2, %v2359_v45 }
 0x197   :  { %1938 = vmatpush3.xpose.msk.msra.mxu0 %vm368_vm2, %v361_v44  ;;  %1939 = vmatprep.mubr.msk.f32.mxu0 %vm2218_vm1, %v2217_v29 }
 0x198   :  { %1947 = vmatprep.subr.mxu0 %v2217_v29 }
 0x199   :  { %v347_v46 = vpop.permute.xlu0 %346  ;;  %v2367_v47 = vpop.permute.xlu1 %348 }
 0x19a   :  { %1940 = vmatmul.mubr.msk.f32.vlgmr.msra.gmra.mxu0 %vm368_vm2, %v347_v46  ;;  %1945 = vmatmul.mubr.msk.f32.vlgmr.msra.gmra.mxu1 %vm368_vm2, %v2367_v47 }
 0x19b   :  { %1949 = vmatprep.mubr.msk.f32.mxu0 %vm2218_vm1, %v2217_v29  ;;  %1954 = vmatprep.mubr.msk.f32.mxu1 %vm2218_vm1, %v2217_v29 }
 0x19d   :  { %v365_v48 = vpop.permute.xlu0 %364  ;;  %v367_v49 = vpop.permute.xlu1 %366 }
 0x19e   :  { %1948 = vmatpush3.xpose.msk.msra.mxu0 %vm368_vm2, %v365_v48  ;;  %1953 = vmatpush3.xpose.msk.msra.mxu1 %vm368_vm2, %v367_v49 }
 0x19f   :  { %1957 = vmatprep.subr.mxu0 %v2217_v29  ;;  %1962 = vmatprep.subr.mxu1 %v2217_v29 }
 0x1a1   :  { %v2380_v50 = vpop.permute.xlu0 %350  ;;  %v2382_v51 = vpop.permute.xlu1 %352 }
 0x1a2   :  { %1950 = vmatmul.mubr.msk.f32.vlgmr.msra.gmra.mxu0 %vm368_vm2, %v2380_v50  ;;  %1955 = vmatmul.mubr.msk.f32.vlgmr.msra.gmra.mxu1 %vm368_vm2, %v2382_v51 }
 0x1a3   :  { %1964 = vmatprep.mubr.msk.f32.mxu1 %vm2218_vm1, %v2217_v29  ;;  %1959 = vmatprep.mubr.msk.f32.mxu0 %vm2218_vm1, %v2217_v29 }
 0x1e0   :  { %v439_v52 = vpop.f32.mrf.mxu1 }
 0x1e1   :  { %v961_v53 = vmul.f32 0.35355338, %v439_v52 }
 0x1e2   :  { %v1921_v54 = vpop.f32.mrf.mxu1 }
 0x1e3   :  { %v969_v55 = vsel %vm368_vm2, %v961_v53, -inf }
 0x1e4   :  { %970 = vmax.xlane.f32.xlu0 %v969_v55  ;;  %v513_v56 = vpop.f32.mrf.mxu1 }
 0x1e5   :  { %v962_v57 = vmul.f32 0.35355338, %v513_v56 }
 0x1e6   :  { %v1926_v58 = vpop.f32.mrf.mxu1 }
 0x1e7   :  { %v972_v59 = vsel %vm368_vm2, %v962_v57, -inf }
 0x1e8   :  { %973 = vmax.xlane.f32.xlu1 %v972_v59 }
 0x251   :  { %v661_v60 = vpop.f32.mrf.mxu1 }
 0x252   :  { %v964_v1 = vmul.f32 0.35355338, %v661_v60 }
 0x253   :  { %v1936_v61 = vpop.f32.mrf.mxu1 }
 0x254   :  { %v978_v10 = vsel %vm368_vm2, %v964_v1, -inf }
 0x256   :  { %v587_v62 = vpop.f32.mrf.mxu0 }
 0x257   :  { %v963_v63 = vmul.f32 0.35355338, %v587_v62 }
 0x258   :  { %v1931_v0 = vpop.f32.mrf.mxu0 }
 0x259   :  { %v975_v2 = vsel %vm368_vm2, %v963_v63, -inf }
 0x25a   :  { %v735_v3 = vpop.f32.mrf.mxu0  ;;  %976 = vmax.xlane.f32.xlu0 %v975_v2  ;;  %v809_v4 = vpop.f32.mrf.mxu1 }
 0x25b   :  { %v965_v5 = vmul.f32 0.35355338, %v735_v3  ;;  %v966_v8 = vmul.f32 0.35355338, %v809_v4 }
 0x25c   :  { %v1941_v6 = vpop.f32.mrf.mxu0  ;;  %v1946_v7 = vpop.f32.mrf.mxu1 }
 0x25d   :  { %v981_v9 = vsel %vm368_vm2, %v965_v5, -inf  ;;  %v984_v11 = vsel %vm368_vm2, %v966_v8, -inf }
 0x25e   :  { %982 = vmax.xlane.f32.xlu1 %v981_v9  ;;  %979 = vmax.xlane.f32.xlu0 %v978_v10 }
 0x262   :  { %v883_v12 = vpop.f32.mrf.mxu0  ;;  %985 = vmax.xlane.f32.xlu0 %v984_v11  ;;  %v957_v13 = vpop.f32.mrf.mxu1 }
 0x263   :  { %v967_v14 = vmul.f32 0.35355338, %v883_v12  ;;  %v968_v15 = vmul.f32 0.35355338, %v957_v13 }
 0x264   :  { %v1951_v16 = vpop.f32.mrf.mxu0  ;;  %v1956_v17 = vpop.f32.mrf.mxu1 }
 0x265   :  { %v987_v18 = vsel %vm368_vm2, %v967_v14, -inf  ;;  %v990_v19 = vsel %vm368_vm2, %v968_v15, -inf }
 0x266   :  { %988 = vmax.xlane.f32.xlu1 %v987_v18  ;;  %991 = vmax.xlane.f32.xlu0 %v990_v19 }
 0x26d   :  { %v971_v23 = vpop.xlane.xlu0 %970 }
 0x26e   :  { %v993_v24 = vsub.f32 %v961_v53, %v971_v23 }
 0x270   :  { %v1001_v25 = vmul.f32 1.442695, %v993_v24 }
 0x271   :  { %v974_v20 = vpop.xlane.xlu1 %973 }
 0x272   :  { %v994_v21 = vsub.f32 %v962_v57, %v974_v20 }
 0x274   :  { %v1003_v22 = vmul.f32 1.442695, %v994_v21 }
 0x276   :  { %2026 = vpow2.f32 %v1003_v22 }
 0x277   :  { %1057 = vrot.lane.b32.xlu1 %v2329_v39, %s2222_s21  ;;  %2028 = vpow2.f32 %v1001_v25 }
 0x27b   :  { %1209 = vrot.lane.b32.xlu1 %v2359_v45, %s2222_s21 }
 0x27c   :  { %1133 = vrot.lane.b32.xlu0 %v2325_v34, %s2222_s21 }
 0x27f   :  { %1285 = vrot.lane.b32.xlu1 %v2347_v41, %s2222_s21 }
 0x280   :  { %1361 = vrot.lane.b32.xlu0 %v347_v46, %s2222_s21 }
 0x283   :  { %1437 = vrot.lane.b32.xlu1 %v2367_v47, %s2222_s21  ;;  %v2411_v26 = vpop.eup %2026 }
 0x284   :  { %v1020_v27 = vsel %vm368_vm2, %v2411_v26, 0.0  ;;  %v2415_v28 = vpop.eup %2028 }
 0x285   :  { %v1017_v30 = vsel %vm368_vm2, %v2415_v28, 0.0 }
 0x29f   :  { %1021 = vadd.xlane.f32.xlu0 %v1020_v27 }
 0x2a7   :  { %1018 = vadd.xlane.f32.xlu1 %v1017_v30 }
 0x2e3   :  { %v977_v31 = vpop.xlane.xlu0 %976 }
 0x2e4   :  { %v995_v32 = vsub.f32 %v963_v63, %v977_v31 }
 0x2e6   :  { %v1005_v33 = vmul.f32 1.442695, %v995_v32 }
 0x2e7   :  { %v983_v34 = vpop.xlane.xlu1 %982  ;;  %v980_v35 = vpop.xlane.xlu0 %979 }
 0x2e8   :  { %2030 = vpow2.f32 %v1005_v33  ;;  %v997_v36 = vsub.f32 %v965_v5, %v983_v34  ;;  %v996_v37 = vsub.f32 %v964_v1, %v980_v35  ;;  %v1700_v34 = vld [vmem:[#allocation11 + $0x18] sm:$0xff]  ;;  %v1699_v35 = vld [vmem:[#allocation11 + $0x10] sm:$0xff] }
 0x2ea   :  { %v1009_v38 = vmul.f32 1.442695, %v997_v36  ;;  %v1007_v39 = vmul.f32 1.442695, %v996_v37  ;;  %v1698_v36 = vld [vmem:[#allocation11 + $0x8] sm:$0xff]  ;;  %v1697_v37 = vld [vmem:[#allocation11] sm:$0xff] }
 0x2eb   :  { %v986_v40 = vpop.xlane.xlu0 %985 }
 0x2ec   :  { %2032 = vpow2.f32 %v1009_v38  ;;  %v998_v41 = vsub.f32 %v966_v8, %v986_v40 }
 0x2ed   :  { %2034 = vpow2.f32 %v1007_v39 }
 0x2ee   :  { %v1011_v42 = vmul.f32 1.442695, %v998_v41 }
 0x2ef   :  { %v989_v43 = vpop.xlane.xlu1 %988  ;;  %v992_v44 = vpop.xlane.xlu0 %991 }
 0x2f0   :  { %2036 = vpow2.f32 %v1011_v42  ;;  %v999_v45 = vsub.f32 %v967_v14, %v989_v43  ;;  %v1000_v46 = vsub.f32 %v968_v15, %v992_v44 }
 0x2f2   :  { %v1013_v47 = vmul.f32 1.442695, %v999_v45  ;;  %v1015_v48 = vmul.f32 1.442695, %v1000_v46 }
 0x2f3   :  { %v1058_v49 = vpop.permute.xlu1 %1057  ;;  %v1134_v52 = vpop.permute.xlu0 %1133 }
 0x2f4   :  { %2038 = vpow2.f32 %v1013_v47  ;;  %1958 = vmatpush3.msra.mxu0 %v1058_v49  ;;  %1963 = vmatpush3.msra.mxu1 %v1134_v52 }
 0x2f5   :  { %v2031_v53 = vpop.eup %2030  ;;  %2040 = vpow2.f32 %v1015_v48  ;;  %1972 = vmatprep.subr.mxu1 %v2217_v29  ;;  %1967 = vmatprep.subr.mxu0 %v2217_v29 }
 0x2f6   :  { %v1023_v54 = vsel %vm368_vm2, %v2031_v53, 0.0 }
 0x2f7   :  { %1024 = vadd.xlane.f32.xlu1 %v1023_v54  ;;  %v1210_v1 = vpop.permute.xlu1 %1209  ;;  %v1362_v2 = vpop.permute.xlu0 %1361 }
 0x2f9   :  { %v2033_v55 = vpop.eup %2032 }
 0x2fa   :  { %v2035_v56 = vpop.eup %2034  ;;  %v1029_v57 = vsel %vm368_vm2, %v2033_v55, 0.0 }
 0x2fb   :  { %1030 = vadd.xlane.f32.xlu1 %v1029_v57  ;;  %v1026_v58 = vsel %vm368_vm2, %v2035_v56, 0.0  ;;  %v1286_v3 = vpop.permute.xlu1 %1285 }
 0x2fc   :  { %1027 = vadd.xlane.f32.xlu0 %v1026_v58 }
 0x2fd   :  { %v2037_v59 = vpop.eup %2036 }
 0x2fe   :  { %v1032_v60 = vsel %vm368_vm2, %v2037_v59, 0.0 }
 0x2ff   :  { %v1438_v5 = vpop.permute.xlu1 %1437 }
 0x300   :  { %1033 = vadd.xlane.f32.xlu0 %v1032_v60 }
 0x301   :  { %v2425_v61 = vpop.eup %2038 }
 0x302   :  { %v2427_v62 = vpop.eup %2040  ;;  %v1035_v63 = vsel %vm368_vm2, %v2425_v61, 0.0 }
 0x303   :  { %1036 = vadd.xlane.f32.xlu1 %v1035_v63  ;;  %v1038_v0 = vsel %vm368_vm2, %v2427_v62, 0.0  ;;  %v1842_v63 = vld [vmem:[%s2490_s8] ss:$0 sm:$0xff] }
 0x304   :  { %1039 = vadd.xlane.f32.xlu0 %v1038_v0 }
 0x314   :  { %1589 = vrot.lane.b32.xlu1 %v2382_v51, %s2222_s21 }
 0x31a   :  { %1513 = vrot.lane.b32.xlu0 %v2380_v50, %s2222_s21 }
 0x328   :  { %v1022_v4 = vpop.xlane.xlu0 %1021 }
 0x329   :  { %2042 = vrcp.f32 %v1022_v4 }
 0x330   :  { %v1019_v6 = vpop.xlane.xlu1 %1018 }
 0x331   :  { %2044 = vrcp.f32 %v1019_v6 }
 0x336   :  { %v2043_v7 = vpop.eup %2042 }
 0x337   :  { %v1050_v8 = vmul.f32 %v2043_v7, %v2411_v26 }
 0x339   :  { %1965 = vmatmul.mubr.msk.f32.vlgmr.msra.gmra.mxu1 %vm368_vm2, %v1050_v8 }
 0x33a   :  { %1973 = vmatpush3.msra.mxu1 %v1286_v3  ;;  %1974 = vmatprep.mubr.msk.f32.mxu1 %vm2218_vm1, %v2217_v29 }
 0x33b   :  { %1982 = vmatprep.subr.mxu1 %v2217_v29 }
 0x33e   :  { %v2045_v50 = vpop.eup %2044 }
 0x33f   :  { %v1049_v51 = vmul.f32 %v2045_v50, %v2415_v28 }
 0x341   :  { %1960 = vmatmul.mubr.msk.f32.vlgmr.msra.gmra.mxu0 %vm368_vm2, %v1049_v51 }
 0x342   :  { %1968 = vmatpush3.msra.mxu0 %v1210_v1  ;;  %1969 = vmatprep.mubr.msk.f32.mxu0 %vm2218_vm1, %v2217_v29 }
 0x343   :  { %1977 = vmatprep.subr.mxu0 %v2217_v29 }
 0x380   :  { %v1025_v9 = vpop.xlane.xlu1 %1024 }
 0x381   :  { %2046 = vrcp.f32 %v1025_v9 }
 0x384   :  { %v1031_v10 = vpop.xlane.xlu1 %1030 }
 0x385   :  { %2048 = vrcp.f32 %v1031_v10  ;;  %v1028_v11 = vpop.xlane.xlu0 %1027 }
 0x386   :  { %2050 = vrcp.f32 %v1028_v11 }
 0x389   :  { %v1034_v12 = vpop.xlane.xlu0 %1033 }
 0x38a   :  { %2052 = vrcp.f32 %v1034_v12 }
 0x38c   :  { %v1037_v13 = vpop.xlane.xlu1 %1036 }
 0x38d   :  { %2054 = vrcp.f32 %v1037_v13  ;;  %v1040_v14 = vpop.xlane.xlu0 %1039 }
 0x38e   :  { %v2047_v15 = vpop.eup %2046  ;;  %2056 = vrcp.f32 %v1040_v14 }
 0x38f   :  { %v1051_v16 = vmul.f32 %v2047_v15, %v2031_v53 }
 0x390   :  { %v1590_v25 = vpop.permute.xlu1 %1589 }
 0x391   :  { %1970 = vmatmul.mubr.msk.f32.vlgmr.msra.gmra.mxu0 %vm368_vm2, %v1051_v16  ;;  %v1514_v21 = vpop.permute.xlu0 %1513 }
 0x392   :  { %v2049_v17 = vpop.eup %2048  ;;  %1978 = vmatpush3.msra.mxu0 %v1362_v2  ;;  %1979 = vmatprep.mubr.msk.f32.mxu0 %vm2218_vm1, %v2217_v29 }
 0x393   :  { %v2051_v18 = vpop.eup %2050  ;;  %1987 = vmatprep.subr.mxu0 %v2217_v29  ;;  %v1053_v19 = vmul.f32 %v2049_v17, %v2033_v55 }
 0x394   :  { %v1052_v20 = vmul.f32 %v2051_v18, %v2035_v56 }
 0x395   :  { %1980 = vmatmul.mubr.msk.f32.vlgmr.msra.gmra.mxu0 %vm368_vm2, %v1053_v19 }
 0x396   :  { %1975 = vmatmul.mubr.msk.f32.vlgmr.msra.gmra.mxu1 %vm368_vm2, %v1052_v20  ;;  %1988 = vmatpush3.msra.mxu0 %v1514_v21 }
 0x397   :  { %v2053_v22 = vpop.eup %2052  ;;  %1983 = vmatpush3.msra.mxu1 %v1438_v5  ;;  %1984 = vmatprep.mubr.msk.f32.mxu1 %vm2218_vm1, %v2217_v29 }
 0x398   :  { %1992 = vmatprep.subr.mxu1 %v2217_v29  ;;  %v1054_v23 = vmul.f32 %v2053_v22, %v2037_v59  ;;  %1989 = vmatprep.mubr.msk.f32.mxu0 %vm2218_vm1, %v2217_v29 }
 0x399   :  { %1997 = vmatprep.subr.mxu0 %v1700_v34 }
 0x39a   :  { %v2055_v24 = vpop.eup %2054  ;;  %1985 = vmatmul.mubr.msk.f32.vlgmr.msra.gmra.mxu1 %vm368_vm2, %v1054_v23 }
 0x39b   :  { %v2057_v26 = vpop.eup %2056  ;;  %1993 = vmatpush3.msra.mxu1 %v1590_v25  ;;  %1994 = vmatprep.mubr.msk.f32.mxu1 %vm2218_vm1, %v2217_v29  ;;  %v1055_v27 = vmul.f32 %v2055_v24, %v2425_v61 }
 0x39c   :  { %v1056_v28 = vmul.f32 %v2057_v26, %v2427_v62 }
 0x39d   :  { %1990 = vmatmul.mubr.msk.f32.vlgmr.msra.gmra.mxu0 %vm368_vm2, %v1055_v27 }
 0x39e   :  { %1995 = vmatmul.mubr.msk.f32.vlgmr.msra.gmra.mxu1 %vm368_vm2, %v1056_v28  ;;  %1998 = vmatpush3.msra.mxu0 %v1700_v34 }
 0x39f   :  { %1999 = vmatprep.subr.mxu0 %v1699_v35 }
 0x3a0   :  { %2000 = vmatpush3.msra.mxu0 %v1699_v35 }
 0x3a1   :  { %2001 = vmatprep.subr.mxu0 %v1698_v36 }
 0x3a2   :  { %2002 = vmatpush3.msra.mxu0 %v1698_v36 }
 0x3a3   :  { %2003 = vmatprep.subr.mxu0 %v1697_v37 }
 0x3a4   :  { %2004 = vmatpush3.msra.mxu0 %v1697_v37 }
 0x3f9   :  { %v1205_v30 = vpop.f32.mrf.mxu1 }
 0x3fb   :  { %v1966_v31 = vpop.f32.mrf.mxu1 }
 0x401   :  { %v1129_v32 = vpop.f32.mrf.mxu0 }
 0x403   :  { %v1961_v33 = vpop.f32.mrf.mxu0 }
 0x451   :  { %v1281_v29 = vpop.f32.mrf.mxu0 }
 0x452   :  { %1667 = vrot.lane.b32.xlu0 %v1281_v29, %s2210_s13 }
 0x453   :  { %v1971_v38 = vpop.f32.mrf.mxu0 }
 0x455   :  { %v1433_v39 = vpop.f32.mrf.mxu0 }
 0x456   :  { %v1357_v40 = vpop.f32.mrf.mxu1  ;;  %1675 = vrot.lane.b32.xlu0 %v1433_v39, %s2223_s22 }
 0x457   :  { %1669 = vrot.lane.b32.xlu1 %v1357_v40, %s2210_s13  ;;  %v1981_v41 = vpop.f32.mrf.mxu0 }
 0x458   :  { %v1976_v42 = vpop.f32.mrf.mxu1 }
 0x45a   :  { %v1509_v43 = vpop.f32.mrf.mxu1 }
 0x45b   :  { %1677 = vrot.lane.b32.xlu1 %v1509_v43, %s2223_s22 }
 0x45c   :  { %v1986_v44 = vpop.f32.mrf.mxu1 }
 0x45d   :  { %v1585_v45 = vpop.f32.mrf.mxu0 }
 0x45e   :  { %v1661_v46 = vpop.f32.mrf.mxu1  ;;  %1683 = vrot.lane.b32.xlu0 %v1585_v45, %s2224_s1 }
 0x45f   :  { %1685 = vrot.lane.b32.xlu1 %v1661_v46, %s2224_s1  ;;  %v1991_v47 = vpop.f32.mrf.mxu0 }
 0x460   :  { %v1996_v48 = vpop.f32.mrf.mxu1 }
 0x4c4   :  { %v1668_v49 = vpop.permute.xlu0 %1667 }
 0x4c5   :  { %v1689_v55 = vsel %vm368_vm2, %v1129_v32, %v1668_v49 }
 0x4c8   :  { %v1676_v53 = vpop.permute.xlu0 %1675 }
 0x4c9   :  { %v1670_v52 = vpop.permute.xlu1 %1669  ;;  %v1692_v56 = vsel %vm1691_vm3, %v1689_v55, %v1676_v53 }
 0x4ca   :  { %v1690_v57 = vsel %vm368_vm2, %v1205_v30, %v1670_v52 }
 0x4cd   :  { %v1678_v54 = vpop.permute.xlu1 %1677 }
 0x4ce   :  { %v1693_v59 = vsel %vm1691_vm3, %v1690_v57, %v1678_v54 }
 0x4d0   :  { %v1684_v58 = vpop.permute.xlu0 %1683 }
 0x4d1   :  { %v1695_v60 = vsel %vm1694_vm4, %v1692_v56, %v1684_v58  ;;  %v1686_v61 = vpop.permute.xlu1 %1685 }
 0x4d2   :  { %v1696_v62 = vsel %vm1694_vm4, %v1693_v59, %v1686_v61  ;;  %2005 = vmatprep.mubr.msk.f32.mxu0 %vm166_vm0, %v1695_v60 }
 0x4d3   :  { %2006 = vmatmul.mubr.msk.f32.vlgmr.msra.gmra.mxu0 %vm166_vm0, %v1696_v62 }
 0x593   :  { %v2007_v0 = vpop.f32.mrf.mxu0 }
 0x594   :  { %v1786_v1 = vadd.f32 %v2007_v0, %v1842_v63 }
 0x595   :  { %v1780_v2 = vpop.f32.mrf.mxu0 }
 0x596   :  { %1790 = vst.msk [vmem:[#allocation13 + $0x8] sm:$0xff] %vm166_vm0, %v1786_v1  ;;  %v1781_v3 = vadd.f32 %v1842_v63, %v1780_v2 }
 0x598   :  { %1789 = vst.msk [vmem:[#allocation13] sm:$0xff] %vm166_vm0, %v1781_v3 }
 0x599   :  { %2189 = shalt.err (!%p2186_p6)
}
 0x59a   :  { %1802 = dma.vmem_to_hbm [thread:$0]  %s1797_s26, 256, %s2491_s9, [#allocation4], %s2209_s12, %s2209_s12, %s2210_s13  }
 0x59b   :  { %2206 = dma.done.wait [#allocation4], 256  }
 0x59c   :  { %2207 = vsyncadd [#allocation4], 4294967040 }
 0x59d   :  { %1806 = vsyncpa [#allocation3], 1 }
 0x59e   :  { %1807 = vsyncpa [#allocation6], 1 }
 0x59f   :  { %1808 = vsyncpa [#allocation9], 1 }
 0x5a0   :  { %1809 = vsyncpa [#allocation12], 1 }
 0x5a1   :  { %1810 = vsyncpa [#allocation4], 1 }

// kernel: tpu_custom_call.1
= control target key start
LH: loop header
LB: loop body
LE: loop exit
PB: predicated region body
PF: predicated region fallthrough
CT: control target
= control target key end

     0   :  { %14 = vsyncpa [#allocation3], 0  ;;  %s2482_s0 = inlined_call_operand.hbm [shape: f32[2,32], index: 0, kind: input, shape index: {}]   ;;  %s2483_s1 = inlined_call_operand.hbm [shape: f32[2,8,32], index: 1, kind: input, shape index: {}]   ;;  %s2484_s2 = inlined_call_operand.hbm [shape: f32[2,8,32], index: 2, kind: input, shape index: {}]   ;;  %s2485_s3 = inlined_call_operand.hbm [shape: f32[32,64], index: 3, kind: input, shape index: {}]   ;;  %s2486_s4 = inlined_call_operand.vmem [shape: f32[1,64], index: 4, kind: input, shape index: {}]   ;;  %s2487_s5 = inlined_call_operand.hbm [shape: f32[32,32], index: 5, kind: input, shape index: {}]   ;;  %s2488_s6 = inlined_call_operand.vmem [shape: f32[1,32], index: 6, kind: input, shape index: {}]   ;;  %s2489_s7 = inlined_call_operand.hbm [shape: f32[32,32], index: 7, kind: input, shape index: {}]   ;;  %s2490_s8 = inlined_call_operand.vmem [shape: f32[1,32], index: 8, kind: input, shape index: {}]   ;;  %s2491_s9 = inlined_call_operand.hbm [shape: f32[2,8,32], index: 9, kind: output, shape index: {}]  }
   0x1   :  { %15 = vsyncpa [#allocation6], 0 }
   0x2   :  { %16 = vsyncpa [#allocation9], 0 }
   0x3   :  { %17 = vsyncpa [#allocation12], 0 }
   0x4   :  { %18 = vsyncpa [#allocation4], 0  ;;  %s2208_s30 = smov [#allocation5]  }
   0x5   :  { %s34_s10 = sshll.u32 %s2208_s30, 4  ;;  %s35_s10 = int_to_ptr.vmem [resolvable:$true] %s34_s10 }
   0x6   :  { %s2066_s11 = scalar_lea.vmem %s35_s10, 256  ;;  %p2071_p1 = scmp.lt.s32.totalorder %s35_s10, %s35_s10 }
   0x7   :  { %p2067_p0 = scmp.ne.s32.totalorder %s35_s10, %s2066_s11  ;;  %p2072_p2 = scmp.lt.s32.totalorder %s2066_s11, %s2066_s11 }
   0x9   :  { %p2073_p3 = por %p2072_p2, %p2071_p1 }
   0xb   :  { %p2074_p4 = pnand %p2073_p3, %p2067_p0 }
   0xd   :  { %2077 = shalt.err (!%p2074_p4)
}
   0xe   :  { %s2209_s12 = smov 128   ;;  %s2210_s13 = smov 8  }
   0xf   :  { %40 = dma.hbm_to_vmem [thread:$0]  %s2483_s1, 256, %s35_s10, [#allocation6], %s2209_s12, %s2209_s12, %s2210_s13  }
  0x10   :  { %s2211_s16 = smov [#allocation8]   ;;  %s2212_s18 = smov [#allocation2]  }
  0x11   :  { %s58_s17 = sshll.u32 %s2211_s16, 4  ;;  %s25_s19 = sshll.u32 %s2212_s18, 4  ;;  %s59_s17 = int_to_ptr.vmem [resolvable:$true] %s58_s17  ;;  %s26_s19 = int_to_ptr.vmem [resolvable:$true] %s25_s19 }
  0x12   :  { %s2086_s20 = scalar_lea.vmem %s59_s17, 512  ;;  %p2091_p6 = scmp.lt.s32.totalorder %s59_s17, %s59_s17 }
  0x13   :  { %p2087_p5 = scmp.ne.s32.totalorder %s59_s17, %s2086_s20  ;;  %p2092_p7 = scmp.lt.s32.totalorder %s2086_s20, %s2086_s20 }
  0x15   :  { %p2093_p8 = por %p2092_p7, %p2091_p6 }
  0x17   :  { %p2094_p9 = pnand %p2093_p8, %p2087_p5 }
  0x19   :  { %2097 = shalt.err (!%p2094_p9)
}
  0x1a   :  { %64 = dma.hbm_to_vmem [thread:$0]  %s2485_s3, 512, %s59_s17, [#allocation9], %s2209_s12, %s2209_s12, %s2210_s13  }
  0x1b   :  { %s2106_s1 = scalar_lea.vmem %s26_s19, 32  ;;  %p2111_p11 = scmp.lt.s32.totalorder %s26_s19, %s26_s19 }
  0x1c   :  { %p2107_p10 = scmp.ne.s32.totalorder %s26_s19, %s2106_s1  ;;  %p2112_p12 = scmp.lt.s32.totalorder %s2106_s1, %s2106_s1 }
  0x1e   :  { %p2113_p13 = por %p2112_p12, %p2111_p11 }
  0x20   :  { %p2114_p0 = pnand %p2113_p13, %p2107_p10 }
  0x22   :  { %2117 = shalt.err (!%p2114_p0)
}
  0x23   :  { %28 = dma.hbm_to_vmem [thread:$0]  %s2482_s0, 32, %s26_s19, [#allocation3]  }
  0x24   :  { %s2213_s25 = smov [#allocation7]   ;;  %s2214_s27 = smov [#allocation10]  }
  0x25   :  { %s46_s26 = sshll.u32 %s2213_s25, 4  ;;  %s72_s28 = sshll.u32 %s2214_s27, 4  ;;  %s47_s26 = int_to_ptr.vmem [resolvable:$true] %s46_s26  ;;  %s73_s28 = int_to_ptr.vmem [resolvable:$true] %s72_s28 }
  0x26   :  { %s2126_s29 = scalar_lea.vmem %s47_s26, 256  ;;  %p2131_p2 = scmp.lt.s32.totalorder %s47_s26, %s47_s26 }
  0x27   :  { %p2127_p1 = scmp.ne.s32.totalorder %s47_s26, %s2126_s29  ;;  %p2132_p3 = scmp.lt.s32.totalorder %s2126_s29, %s2126_s29 }
  0x29   :  { %p2133_p4 = por %p2132_p3, %p2131_p2 }
  0x2b   :  { %p2134_p5 = pnand %p2133_p4, %p2127_p1 }
  0x2d   :  { %2137 = shalt.err (!%p2134_p5)
}
  0x2e   :  { %52 = dma.hbm_to_vmem [thread:$0]  %s2484_s2, 256, %s47_s26, [#allocation6], %s2209_s12, %s2209_s12, %s2210_s13  }
  0x2f   :  { %s2146_s0 = scalar_lea.vmem %s73_s28, 512  ;;  %p2151_p7 = scmp.lt.s32.totalorder %s73_s28, %s73_s28 }
  0x30   :  { %p2147_p6 = scmp.ne.s32.totalorder %s73_s28, %s2146_s0  ;;  %p2152_p8 = scmp.lt.s32.totalorder %s2146_s0, %s2146_s0 }
  0x32   :  { %p2153_p9 = por %p2152_p8, %p2151_p7 }
  0x34   :  { %p2154_p10 = pnand %p2153_p9, %p2147_p6 }
  0x36   :  { %2157 = shalt.err (!%p2154_p10)
}
  0x37   :  { %78 = dma.hbm_to_vmem [thread:$0]  %s2487_s5, 512, %s73_s28, [#allocation9], %s2209_s12, %s2209_s12, %s2210_s13  }
  0x38   :  { %s2215_s14 = smov [#allocation11]  }
  0x39   :  { %s86_s15 = sshll.u32 %s2215_s14, 4  ;;  %s87_s15 = int_to_ptr.vmem [resolvable:$true] %s86_s15 }
  0x3a   :  { %s2166_s16 = scalar_lea.vmem %s87_s15, 512  ;;  %p2171_p12 = scmp.lt.s32.totalorder %s87_s15, %s87_s15 }
  0x3b   :  { %p2167_p11 = scmp.ne.s32.totalorder %s87_s15, %s2166_s16  ;;  %p2172_p13 = scmp.lt.s32.totalorder %s2166_s16, %s2166_s16 }
  0x3d   :  { %p2173_p0 = por %p2172_p13, %p2171_p12 }
  0x3f   :  { %p2174_p1 = pnand %p2173_p0, %p2167_p11 }
  0x41   :  { %2177 = shalt.err (!%p2174_p1)
}
  0x42   :  { %92 = dma.hbm_to_vmem [thread:$0]  %s2489_s7, 512, %s87_s15, [#allocation12], %s2209_s12, %s2209_s12, %s2210_s13  }
  0x43   :  { %2198 = dma.done.wait [#allocation3], 32  }
  0x44   :  { %2199 = vsyncadd [#allocation3], 4294967264 }
  0x45   :  { %2200 = dma.done.wait [#allocation6], 512  }
  0x46   :  { %2201 = vsyncadd [#allocation6], 4294966784 }
  0x47   :  { %2202 = dma.done.wait [#allocation9], 1024  }
  0x48   :  { %2203 = vsyncadd [#allocation9], 4294966272 }
  0x49   :  { %2204 = dma.done.wait [#allocation12], 512  }
  0x4a   :  { %2205 = vsyncadd [#allocation12], 4294966784  ;;  %v128_v0 = vlaneseq  ;;  %v2216_v1 = vmov 1966171168   ;;  %v158_v6 = vld [vmem:[#allocation8 + $0x18] sm:$0xff]  ;;  %v157_v8 = vld [vmem:[#allocation8 + $0x10] sm:$0xff] }
  0x4b   :  { %v126_v2 = vunpack.c.l.s4 %v2216_v1  ;;  %v251_v7 = vld [vmem:[#allocation10 + $0x18] sm:$0xff]  ;;  %1895 = vmatprep.subr.mxu0 %v158_v6  ;;  %v250_v9 = vld [vmem:[#allocation10 + $0x10] sm:$0xff]  ;;  %v156_v11 = vld [vmem:[#allocation8 + $0x8] sm:$0xff]  ;;  %vm166_vm0 = vcmask 261120   ;;  %v2217_v29 = vmov 0.0   ;;  %vm2218_vm1 = vmmov 0  }
  0x4c   :  { %v129_v3 = vshrl.u32 %v128_v0, 7  ;;  %1906 = vmatprep.subr.mxu1 %v251_v7  ;;  %1896 = vmatpush3.msra.mxu0 %v158_v6  ;;  %v249_v12 = vld [vmem:[#allocation10 + $0x8] sm:$0xff]  ;;  %v1811_v13 = vld.sshfl [vmem:[#allocation2] sm:$0x11 pattern:$0x75316420] }
  0x4d   :  { %v127_v4 = vunpack.c.0.s8 %v126_v2  ;;  %1907 = vmatpush3.msra.mxu1 %v251_v7  ;;  %1897 = vmatprep.subr.mxu0 %v157_v8  ;;  %v155_v14 = vld [vmem:[#allocation8] sm:$0xff]  ;;  %v124_v15 = vcombine.high %v1811_v13, %v1811_v13  ;;  %v151_v19 = vld [vmem:[#allocation7] sm:$0xff]  ;;  %v115_v22 = vld [vmem:[#allocation5 + $0x8] sm:$0xff]  ;;  %vm368_vm2 = vcmask 64512   ;;  %s2219_s20 = smov 120   ;;  %s2222_s21 = smov 96  }
  0x4e   :  { %v141_v10 = vsub.s32 0, %v129_v3  ;;  %1908 = vmatprep.subr.mxu1 %v250_v9  ;;  %1898 = vmatpush3.msra.mxu0 %v157_v8  ;;  %v248_v17 = vld [vmem:[#allocation10] sm:$0xff]  ;;  %v152_v23 = vld [vmem:[#allocation7 + $0x8] sm:$0xff]  ;;  %s2223_s22 = smov 16   ;;  %s2224_s1 = smov 24   ;;  %vm1691_vm3 = vcmask 130048  }
  0x4f   :  { %v130_v5 = vsub.s32 %v127_v4, %v129_v3  ;;  %1909 = vmatpush3.msra.mxu1 %v250_v9  ;;  %v114_v18 = vld [vmem:[#allocation5] sm:$0xff]  ;;  %1899 = vmatprep.subr.mxu0 %v156_v11  ;;  %v1812_v30 = vld [vmem:[%s2486_s4] ss:$0 sm:$0xff]  ;;  %s2220_s4 = smov 112   ;;  %vm1694_vm4 = vcmask 195584   ;;  %s2225_s25 = smov [#allocation13]  }
  0x50   :  { %1910 = vmatprep.subr.mxu1 %v249_v12  ;;  %1900 = vmatpush3.msra.mxu0 %v156_v11  ;;  %v1815_v31 = vld [vmem:[%s2488_s6] ss:$0 sm:$0xff]  ;;  %s2221_s6 = smov 104   ;;  %s1796_s26 = sshll.u32 %s2225_s25, 4  ;;  %s1797_s26 = int_to_ptr.vmem [resolvable:$true] %s1796_s26 }
  0x51   :  { %v131_v16 = vrot.slane %v1811_v13, %v130_v5  ;;  %v138_v20 = vrot.slane %v124_v15, %v130_v5  ;;  %1911 = vmatpush3.msra.mxu1 %v249_v12  ;;  %1901 = vmatprep.subr.mxu0 %v155_v14  ;;  %s2178_s27 = scalar_lea.vmem %s1797_s26, 256  ;;  %p2183_p3 = scmp.lt.s32.totalorder %s1797_s26, %s1797_s26 }
  0x52   :  { %1912 = vmatprep.subr.mxu1 %v248_v17  ;;  %1902 = vmatpush3.msra.mxu0 %v155_v14  ;;  %p2179_p2 = scmp.ne.s32.totalorder %s1797_s26, %s2178_s27  ;;  %p2184_p4 = scmp.lt.s32.totalorder %s2178_s27, %s2178_s27 }
  0x53   :  { %v142_v21 = vrot.slane %v131_v16, %v141_v10  ;;  %v146_v24 = vrot.slane %v138_v20, %v141_v10  ;;  %1913 = vmatpush3.msra.mxu1 %v248_v17  ;;  %1927 = vmatprep.subr.mxu0 %v2217_v29 }
  0x54   :  { %1917 = vmatprep.subr.mxu1 %v2217_v29  ;;  %p2185_p5 = por %p2184_p4, %p2183_p3 }
  0x55   :  { %v149_v25 = vadd.f32 %v142_v21, %v114_v18  ;;  %v153_v26 = vadd.f32 %v151_v19, %v142_v21  ;;  %v150_v27 = vadd.f32 %v146_v24, %v115_v22  ;;  %v154_v28 = vadd.f32 %v152_v23, %v146_v24 }
  0x56   :  { %p2186_p6 = pnand %p2185_p5, %p2179_p2 }
  0x57   :  { %1903 = vmatprep.mubr.msk.f32.mxu0 %vm166_vm0, %v149_v25  ;;  %1914 = vmatprep.mubr.msk.f32.mxu1 %vm166_vm0, %v153_v26 }
  0x58   :  { %1904 = vmatmul.mubr.msk.f32.vlgmr.msra.gmra.mxu0 %vm166_vm0, %v150_v27  ;;  %1915 = vmatmul.mubr.msk.f32.vlgmr.msra.gmra.mxu1 %vm166_vm0, %v154_v28 }
  0x59   :  { %1919 = vmatprep.mubr.msk.f32.mxu1 %vm2218_vm1, %v2217_v29  ;;  %1929 = vmatprep.mubr.msk.f32.mxu0 %vm2218_vm1, %v2217_v29 }
 0x118   :  { %v1905_v32 = vpop.f32.mrf.mxu0  ;;  %v1916_v33 = vpop.f32.mrf.mxu1 }
 0x119   :  { %v2325_v34 = vadd.f32 %v1905_v32, %v1812_v30  ;;  %v337_v35 = vadd.f32 %v1916_v33, %v1815_v31 }
 0x11a   :  { %v331_v36 = vpop.f32.mrf.mxu1  ;;  %v239_v37 = vpop.f32.mrf.mxu0 }
 0x11b   :  { %v332_v38 = vadd.f32 %v1815_v31, %v331_v36  ;;  %358 = vrot.lane.b32.xlu0 %v337_v35, %s2219_s20  ;;  %344 = vrot.lane.b32.xlu1 %v2325_v34, %s2219_s20  ;;  %v2329_v39 = vadd.f32 %v1812_v30, %v239_v37 }
 0x11d   :  { %1918 = vmatpush3.xpose.msk.msra.mxu1 %vm368_vm2, %v332_v38 }
 0x11e   :  { %1922 = vmatprep.subr.mxu1 %v2217_v29 }
 0x11f   :  { %356 = vrot.lane.b32.xlu0 %v332_v38, %s2219_s20  ;;  %362 = vrot.lane.b32.xlu1 %v337_v35, %s2220_s4 }
 0x120   :  { %1920 = vmatmul.mubr.msk.f32.vlgmr.msra.gmra.mxu1 %vm368_vm2, %v2329_v39 }
 0x121   :  { %1923 = vmatpush3.xpose.msk.msra.mxu1 %vm368_vm2, %v337_v35  ;;  %1924 = vmatprep.mubr.msk.f32.mxu1 %vm2218_vm1, %v2217_v29 }
 0x122   :  { %1932 = vmatprep.subr.mxu1 %v2217_v29 }
 0x123   :  { %360 = vrot.lane.b32.xlu0 %v332_v38, %s2220_s4  ;;  %342 = vrot.lane.b32.xlu1 %v2329_v39, %s2219_s20 }
 0x124   :  { %1925 = vmatmul.mubr.msk.f32.vlgmr.msra.gmra.mxu1 %vm368_vm2, %v2325_v34 }
 0x125   :  { %1934 = vmatprep.mubr.msk.f32.mxu1 %vm2218_vm1, %v2217_v29 }
 0x127   :  { %346 = vrot.lane.b32.xlu0 %v2329_v39, %s2220_s4  ;;  %348 = vrot.lane.b32.xlu1 %v2325_v34, %s2220_s4 }
 0x12b   :  { %364 = vrot.lane.b32.xlu0 %v332_v38, %s2221_s6  ;;  %366 = vrot.lane.b32.xlu1 %v337_v35, %s2221_s6 }
 0x12f   :  { %350 = vrot.lane.b32.xlu0 %v2329_v39, %s2221_s6  ;;  %352 = vrot.lane.b32.xlu1 %v2325_v34, %s2221_s6 }
 0x18d   :  { %v359_v40 = vpop.permute.xlu0 %358  ;;  %v2347_v41 = vpop.permute.xlu1 %344 }
 0x18e   :  { %1933 = vmatpush3.xpose.msk.msra.mxu1 %vm368_vm2, %v359_v40 }
 0x18f   :  { %1942 = vmatprep.subr.mxu1 %v2217_v29 }
 0x191   :  { %v357_v42 = vpop.permute.xlu0 %356  ;;  %v363_v43 = vpop.permute.xlu1 %362  ;;  %1935 = vmatmul.mubr.msk.f32.vlgmr.msra.gmra.mxu1 %vm368_vm2, %v2347_v41 }
 0x192   :  { %1928 = vmatpush3.xpose.msk.msra.mxu0 %vm368_vm2, %v357_v42  ;;  %1943 = vmatpush3.xpose.msk.msra.mxu1 %vm368_vm2, %v363_v43 }
 0x193   :  { %1937 = vmatprep.subr.mxu0 %v2217_v29  ;;  %1944 = vmatprep.mubr.msk.f32.mxu1 %vm2218_vm1, %v2217_v29 }
 0x194   :  { %1952 = vmatprep.subr.mxu1 %v2217_v29 }
 0x195   :  { %v361_v44 = vpop.permute.xlu0 %360  ;;  %v2359_v45 = vpop.permute.xlu1 %342 }
 0x196   :  { %1930 = vmatmul.mubr.msk.f32.vlgmr.msra.gmra.mxu0 %vm368_vm2, %v2359_v45 }
 0x197   :  { %1938 = vmatpush3.xpose.msk.msra.mxu0 %vm368_vm2, %v361_v44  ;;  %1939 = vmatprep.mubr.msk.f32.mxu0 %vm2218_vm1, %v2217_v29 }
 0x198   :  { %1947 = vmatprep.subr.mxu0 %v2217_v29 }
 0x199   :  { %v347_v46 = vpop.permute.xlu0 %346  ;;  %v2367_v47 = vpop.permute.xlu1 %348 }
 0x19a   :  { %1940 = vmatmul.mubr.msk.f32.vlgmr.msra.gmra.mxu0 %vm368_vm2, %v347_v46  ;;  %1945 = vmatmul.mubr.msk.f32.vlgmr.msra.gmra.mxu1 %vm368_vm2, %v2367_v47 }
 0x19b   :  { %1949 = vmatprep.mubr.msk.f32.mxu0 %vm2218_vm1, %v2217_v29  ;;  %1954 = vmatprep.mubr.msk.f32.mxu1 %vm2218_vm1, %v2217_v29 }
 0x19d   :  { %v365_v48 = vpop.permute.xlu0 %364  ;;  %v367_v49 = vpop.permute.xlu1 %366 }
 0x19e   :  { %1948 = vmatpush3.xpose.msk.msra.mxu0 %vm368_vm2, %v365_v48  ;;  %1953 = vmatpush3.xpose.msk.msra.mxu1 %vm368_vm2, %v367_v49 }
 0x19f   :  { %1957 = vmatprep.subr.mxu0 %v2217_v29  ;;  %1962 = vmatprep.subr.mxu1 %v2217_v29 }
 0x1a1   :  { %v2380_v50 = vpop.permute.xlu0 %350  ;;  %v2382_v51 = vpop.permute.xlu1 %352 }
 0x1a2   :  { %1950 = vmatmul.mubr.msk.f32.vlgmr.msra.gmra.mxu0 %vm368_vm2, %v2380_v50  ;;  %1955 = vmatmul.mubr.msk.f32.vlgmr.msra.gmra.mxu1 %vm368_vm2, %v2382_v51 }
 0x1a3   :  { %1964 = vmatprep.mubr.msk.f32.mxu1 %vm2218_vm1, %v2217_v29  ;;  %1959 = vmatprep.mubr.msk.f32.mxu0 %vm2218_vm1, %v2217_v29 }
 0x1e0   :  { %v439_v52 = vpop.f32.mrf.mxu1 }
 0x1e1   :  { %v961_v53 = vmul.f32 0.35355338, %v439_v52 }
 0x1e2   :  { %v1921_v54 = vpop.f32.mrf.mxu1 }
 0x1e3   :  { %v969_v55 = vsel %vm368_vm2, %v961_v53, -inf }
 0x1e4   :  { %970 = vmax.xlane.f32.xlu0 %v969_v55  ;;  %v513_v56 = vpop.f32.mrf.mxu1 }
 0x1e5   :  { %v962_v57 = vmul.f32 0.35355338, %v513_v56 }
 0x1e6   :  { %v1926_v58 = vpop.f32.mrf.mxu1 }
 0x1e7   :  { %v972_v59 = vsel %vm368_vm2, %v962_v57, -inf }
 0x1e8   :  { %973 = vmax.xlane.f32.xlu1 %v972_v59 }
 0x251   :  { %v661_v60 = vpop.f32.mrf.mxu1 }
 0x252   :  { %v964_v1 = vmul.f32 0.35355338, %v661_v60 }
 0x253   :  { %v1936_v61 = vpop.f32.mrf.mxu1 }
 0x254   :  { %v978_v10 = vsel %vm368_vm2, %v964_v1, -inf }
 0x256   :  { %v587_v62 = vpop.f32.mrf.mxu0 }
 0x257   :  { %v963_v63 = vmul.f32 0.35355338, %v587_v62 }
 0x258   :  { %v1931_v0 = vpop.f32.mrf.mxu0 }
 0x259   :  { %v975_v2 = vsel %vm368_vm2, %v963_v63, -inf }
 0x25a   :  { %v735_v3 = vpop.f32.mrf.mxu0  ;;  %976 = vmax.xlane.f32.xlu0 %v975_v2  ;;  %v809_v4 = vpop.f32.mrf.mxu1 }
 0x25b   :  { %v965_v5 = vmul.f32 0.35355338, %v735_v3  ;;  %v966_v8 = vmul.f32 0.35355338, %v809_v4 }
 0x25c   :  { %v1941_v6 = vpop.f32.mrf.mxu0  ;;  %v1946_v7 = vpop.f32.mrf.mxu1 }
 0x25d   :  { %v981_v9 = vsel %vm368_vm2, %v965_v5, -inf  ;;  %v984_v11 = vsel %vm368_vm2, %v966_v8, -inf }
 0x25e   :  { %982 = vmax.xlane.f32.xlu1 %v981_v9  ;;  %979 = vmax.xlane.f32.xlu0 %v978_v10 }
 0x262   :  { %v883_v12 = vpop.f32.mrf.mxu0  ;;  %985 = vmax.xlane.f32.xlu0 %v984_v11  ;;  %v957_v13 = vpop.f32.mrf.mxu1 }
 0x263   :  { %v967_v14 = vmul.f32 0.35355338, %v883_v12  ;;  %v968_v15 = vmul.f32 0.35355338, %v957_v13 }
 0x264   :  { %v1951_v16 = vpop.f32.mrf.mxu0  ;;  %v1956_v17 = vpop.f32.mrf.mxu1 }
 0x265   :  { %v987_v18 = vsel %vm368_vm2, %v967_v14, -inf  ;;  %v990_v19 = vsel %vm368_vm2, %v968_v15, -inf }
 0x266   :  { %988 = vmax.xlane.f32.xlu1 %v987_v18  ;;  %991 = vmax.xlane.f32.xlu0 %v990_v19 }
 0x26d   :  { %v971_v23 = vpop.xlane.xlu0 %970 }
 0x26e   :  { %v993_v24 = vsub.f32 %v961_v53, %v971_v23 }
 0x270   :  { %v1001_v25 = vmul.f32 1.442695, %v993_v24 }
 0x271   :  { %v974_v20 = vpop.xlane.xlu1 %973 }
 0x272   :  { %v994_v21 = vsub.f32 %v962_v57, %v974_v20 }
 0x274   :  { %v1003_v22 = vmul.f32 1.442695, %v994_v21 }
 0x276   :  { %2026 = vpow2.f32 %v1003_v22 }
 0x277   :  { %1057 = vrot.lane.b32.xlu1 %v2329_v39, %s2222_s21  ;;  %2028 = vpow2.f32 %v1001_v25 }
 0x27b   :  { %1209 = vrot.lane.b32.xlu1 %v2359_v45, %s2222_s21 }
 0x27c   :  { %1133 = vrot.lane.b32.xlu0 %v2325_v34, %s2222_s21 }
 0x27f   :  { %1285 = vrot.lane.b32.xlu1 %v2347_v41, %s2222_s21 }
 0x280   :  { %1361 = vrot.lane.b32.xlu0 %v347_v46, %s2222_s21 }
 0x283   :  { %1437 = vrot.lane.b32.xlu1 %v2367_v47, %s2222_s21  ;;  %v2411_v26 = vpop.eup %2026 }
 0x284   :  { %v1020_v27 = vsel %vm368_vm2, %v2411_v26, 0.0  ;;  %v2415_v28 = vpop.eup %2028 }
 0x285   :  { %v1017_v30 = vsel %vm368_vm2, %v2415_v28, 0.0 }
 0x29f   :  { %1021 = vadd.xlane.f32.xlu0 %v1020_v27 }
 0x2a7   :  { %1018 = vadd.xlane.f32.xlu1 %v1017_v30 }
 0x2e3   :  { %v977_v31 = vpop.xlane.xlu0 %976 }
 0x2e4   :  { %v995_v32 = vsub.f32 %v963_v63, %v977_v31 }
 0x2e6   :  { %v1005_v33 = vmul.f32 1.442695, %v995_v32 }
 0x2e7   :  { %v983_v34 = vpop.xlane.xlu1 %982  ;;  %v980_v35 = vpop.xlane.xlu0 %979 }
 0x2e8   :  { %2030 = vpow2.f32 %v1005_v33  ;;  %v997_v36 = vsub.f32 %v965_v5, %v983_v34  ;;  %v996_v37 = vsub.f32 %v964_v1, %v980_v35  ;;  %v1700_v34 = vld [vmem:[#allocation11 + $0x18] sm:$0xff]  ;;  %v1699_v35 = vld [vmem:[#allocation11 + $0x10] sm:$0xff] }
 0x2ea   :  { %v1009_v38 = vmul.f32 1.442695, %v997_v36  ;;  %v1007_v39 = vmul.f32 1.442695, %v996_v37  ;;  %v1698_v36 = vld [vmem:[#allocation11 + $0x8] sm:$0xff]  ;;  %v1697_v37 = vld [vmem:[#allocation11] sm:$0xff] }
 0x2eb   :  { %v986_v40 = vpop.xlane.xlu0 %985 }
 0x2ec   :  { %2032 = vpow2.f32 %v1009_v38  ;;  %v998_v41 = vsub.f32 %v966_v8, %v986_v40 }
 0x2ed   :  { %2034 = vpow2.f32 %v1007_v39 }
 0x2ee   :  { %v1011_v42 = vmul.f32 1.442695, %v998_v41 }
 0x2ef   :  { %v989_v43 = vpop.xlane.xlu1 %988  ;;  %v992_v44 = vpop.xlane.xlu0 %991 }
 0x2f0   :  { %2036 = vpow2.f32 %v1011_v42  ;;  %v999_v45 = vsub.f32 %v967_v14, %v989_v43  ;;  %v1000_v46 = vsub.f32 %v968_v15, %v992_v44 }
 0x2f2   :  { %v1013_v47 = vmul.f32 1.442695, %v999_v45  ;;  %v1015_v48 = vmul.f32 1.442695, %v1000_v46 }
 0x2f3   :  { %v1058_v49 = vpop.permute.xlu1 %1057  ;;  %v1134_v52 = vpop.permute.xlu0 %1133 }
 0x2f4   :  { %2038 = vpow2.f32 %v1013_v47  ;;  %1958 = vmatpush3.msra.mxu0 %v1058_v49  ;;  %1963 = vmatpush3.msra.mxu1 %v1134_v52 }
 0x2f5   :  { %v2031_v53 = vpop.eup %2030  ;;  %2040 = vpow2.f32 %v1015_v48  ;;  %1972 = vmatprep.subr.mxu1 %v2217_v29  ;;  %1967 = vmatprep.subr.mxu0 %v2217_v29 }
 0x2f6   :  { %v1023_v54 = vsel %vm368_vm2, %v2031_v53, 0.0 }
 0x2f7   :  { %1024 = vadd.xlane.f32.xlu1 %v1023_v54  ;;  %v1210_v1 = vpop.permute.xlu1 %1209  ;;  %v1362_v2 = vpop.permute.xlu0 %1361 }
 0x2f9   :  { %v2033_v55 = vpop.eup %2032 }
 0x2fa   :  { %v2035_v56 = vpop.eup %2034  ;;  %v1029_v57 = vsel %vm368_vm2, %v2033_v55, 0.0 }
 0x2fb   :  { %1030 = vadd.xlane.f32.xlu1 %v1029_v57  ;;  %v1026_v58 = vsel %vm368_vm2, %v2035_v56, 0.0  ;;  %v1286_v3 = vpop.permute.xlu1 %1285 }
 0x2fc   :  { %1027 = vadd.xlane.f32.xlu0 %v1026_v58 }
 0x2fd   :  { %v2037_v59 = vpop.eup %2036 }
 0x2fe   :  { %v1032_v60 = vsel %vm368_vm2, %v2037_v59, 0.0 }
 0x2ff   :  { %v1438_v5 = vpop.permute.xlu1 %1437 }
 0x300   :  { %1033 = vadd.xlane.f32.xlu0 %v1032_v60 }
 0x301   :  { %v2425_v61 = vpop.eup %2038 }
 0x302   :  { %v2427_v62 = vpop.eup %2040  ;;  %v1035_v63 = vsel %vm368_vm2, %v2425_v61, 0.0 }
 0x303   :  { %1036 = vadd.xlane.f32.xlu1 %v1035_v63  ;;  %v1038_v0 = vsel %vm368_vm2, %v2427_v62, 0.0  ;;  %v1842_v63 = vld [vmem:[%s2490_s8] ss:$0 sm:$0xff] }
 0x304   :  { %1039 = vadd.xlane.f32.xlu0 %v1038_v0 }
 0x314   :  { %1589 = vrot.lane.b32.xlu1 %v2382_v51, %s2222_s21 }
 0x31a   :  { %1513 = vrot.lane.b32.xlu0 %v2380_v50, %s2222_s21 }
 0x328   :  { %v1022_v4 = vpop.xlane.xlu0 %1021 }
 0x329   :  { %2042 = vrcp.f32 %v1022_v4 }
 0x330   :  { %v1019_v6 = vpop.xlane.xlu1 %1018 }
 0x331   :  { %2044 = vrcp.f32 %v1019_v6 }
 0x336   :  { %v2043_v7 = vpop.eup %2042 }
 0x337   :  { %v1050_v8 = vmul.f32 %v2043_v7, %v2411_v26 }
 0x339   :  { %1965 = vmatmul.mubr.msk.f32.vlgmr.msra.gmra.mxu1 %vm368_vm2, %v1050_v8 }
 0x33a   :  { %1973 = vmatpush3.msra.mxu1 %v1286_v3  ;;  %1974 = vmatprep.mubr.msk.f32.mxu1 %vm2218_vm1, %v2217_v29 }
 0x33b   :  { %1982 = vmatprep.subr.mxu1 %v2217_v29 }
 0x33e   :  { %v2045_v50 = vpop.eup %2044 }
 0x33f   :  { %v1049_v51 = vmul.f32 %v2045_v50, %v2415_v28 }
 0x341   :  { %1960 = vmatmul.mubr.msk.f32.vlgmr.msra.gmra.mxu0 %vm368_vm2, %v1049_v51 }
 0x342   :  { %1968 = vmatpush3.msra.mxu0 %v1210_v1  ;;  %1969 = vmatprep.mubr.msk.f32.mxu0 %vm2218_vm1, %v2217_v29 }
 0x343   :  { %1977 = vmatprep.subr.mxu0 %v2217_v29 }
 0x380   :  { %v1025_v9 = vpop.xlane.xlu1 %1024 }
 0x381   :  { %2046 = vrcp.f32 %v1025_v9 }
 0x384   :  { %v1031_v10 = vpop.xlane.xlu1 %1030 }
 0x385   :  { %2048 = vrcp.f32 %v1031_v10  ;;  %v1028_v11 = vpop.xlane.xlu0 %1027 }
 0x386   :  { %2050 = vrcp.f32 %v1028_v11 }
 0x389   :  { %v1034_v12 = vpop.xlane.xlu0 %1033 }
 0x38a   :  { %2052 = vrcp.f32 %v1034_v12 }
 0x38c   :  { %v1037_v13 = vpop.xlane.xlu1 %1036 }
 0x38d   :  { %2054 = vrcp.f32 %v1037_v13  ;;  %v1040_v14 = vpop.xlane.xlu0 %1039 }
 0x38e   :  { %v2047_v15 = vpop.eup %2046  ;;  %2056 = vrcp.f32 %v1040_v14 }
 0x38f   :  { %v1051_v16 = vmul.f32 %v2047_v15, %v2031_v53 }
 0x390   :  { %v1590_v25 = vpop.permute.xlu1 %1589 }
 0x391   :  { %1970 = vmatmul.mubr.msk.f32.vlgmr.msra.gmra.mxu0 %vm368_vm2, %v1051_v16  ;;  %v1514_v21 = vpop.permute.xlu0 %1513 }
 0x392   :  { %v2049_v17 = vpop.eup %2048  ;;  %1978 = vmatpush3.msra.mxu0 %v1362_v2  ;;  %1979 = vmatprep.mubr.msk.f32.mxu0 %vm2218_vm1, %v2217_v29 }
 0x393   :  { %v2051_v18 = vpop.eup %2050  ;;  %1987 = vmatprep.subr.mxu0 %v2217_v29  ;;  %v1053_v19 = vmul.f32 %v2049_v17, %v2033_v55 }
 0x394   :  { %v1052_v20 = vmul.f32 %v2051_v18, %v2035_v56 }
 0x395   :  { %1980 = vmatmul.mubr.msk.f32.vlgmr.msra.gmra.mxu0 %vm368_vm2, %v1053_v19 }
 0x396   :  { %1975 = vmatmul.mubr.msk.f32.vlgmr.msra.gmra.mxu1 %vm368_vm2, %v1052_v20  ;;  %1988 = vmatpush3.msra.mxu0 %v1514_v21 }
 0x397   :  { %v2053_v22 = vpop.eup %2052  ;;  %1983 = vmatpush3.msra.mxu1 %v1438_v5  ;;  %1984 = vmatprep.mubr.msk.f32.mxu1 %vm2218_vm1, %v2217_v29 }
 0x398   :  { %1992 = vmatprep.subr.mxu1 %v2217_v29  ;;  %v1054_v23 = vmul.f32 %v2053_v22, %v2037_v59  ;;  %1989 = vmatprep.mubr.msk.f32.mxu0 %vm2218_vm1, %v2217_v29 }
 0x399   :  { %1997 = vmatprep.subr.mxu0 %v1700_v34 }
 0x39a   :  { %v2055_v24 = vpop.eup %2054  ;;  %1985 = vmatmul.mubr.msk.f32.vlgmr.msra.gmra.mxu1 %vm368_vm2, %v1054_v23 }
 0x39b   :  { %v2057_v26 = vpop.eup %2056  ;;  %1993 = vmatpush3.msra.mxu1 %v1590_v25  ;;  %1994 = vmatprep.mubr.msk.f32.mxu1 %vm2218_vm1, %v2217_v29  ;;  %v1055_v27 = vmul.f32 %v2055_v24, %v2425_v61 }
 0x39c   :  { %v1056_v28 = vmul.f32 %v2057_v26, %v2427_v62 }
 0x39d   :  { %1990 = vmatmul.mubr.msk.f32.vlgmr.msra.gmra.mxu0 %vm368_vm2, %v1055_v27 }
 0x39e   :  { %1995 = vmatmul.mubr.msk.f32.vlgmr.msra.gmra.mxu1 %vm368_vm2, %v1056_v28  ;;  %1998 = vmatpush3.msra.mxu0 %v1700_v34 }
 0x39f   :  { %1999 = vmatprep.subr.mxu0 %v1699_v35 }
 0x3a0   :  { %2000 = vmatpush3.msra.mxu0 %v1699_v35 }
 0x3a1   :  { %2001 = vmatprep.subr.mxu0 %v1698_v36 }
 0x3a2   :  { %2002 = vmatpush3.msra.mxu0 %v1698_v36 }
 0x3a3   :  { %2003 = vmatprep.subr.mxu0 %v1697_v37 }
 0x3a4   :  { %2004 = vmatpush3.msra.mxu0 %v1697_v37 }
 0x3f9   :  { %v1205_v30 = vpop.f32.mrf.mxu1 }
 0x3fb   :  { %v1966_v31 = vpop.f32.mrf.mxu1 }
 0x401   :  { %v1129_v32 = vpop.f32.mrf.mxu0 }
 0x403   :  { %v1961_v33 = vpop.f32.mrf.mxu0 }
 0x451   :  { %v1281_v29 = vpop.f32.mrf.mxu0 }
 0x452   :  { %1667 = vrot.lane.b32.xlu0 %v1281_v29, %s2210_s13 }
 0x453   :  { %v1971_v38 = vpop.f32.mrf.mxu0 }
 0x455   :  { %v1433_v39 = vpop.f32.mrf.mxu0 }
 0x456   :  { %v1357_v40 = vpop.f32.mrf.mxu1  ;;  %1675 = vrot.lane.b32.xlu0 %v1433_v39, %s2223_s22 }
 0x457   :  { %1669 = vrot.lane.b32.xlu1 %v1357_v40, %s2210_s13  ;;  %v1981_v41 = vpop.f32.mrf.mxu0 }
 0x458   :  { %v1976_v42 = vpop.f32.mrf.mxu1 }
 0x45a   :  { %v1509_v43 = vpop.f32.mrf.mxu1 }
 0x45b   :  { %1677 = vrot.lane.b32.xlu1 %v1509_v43, %s2223_s22 }
 0x45c   :  { %v1986_v44 = vpop.f32.mrf.mxu1 }
 0x45d   :  { %v1585_v45 = vpop.f32.mrf.mxu0 }
 0x45e   :  { %v1661_v46 = vpop.f32.mrf.mxu1  ;;  %1683 = vrot.lane.b32.xlu0 %v1585_v45, %s2224_s1 }
 0x45f   :  { %1685 = vrot.lane.b32.xlu1 %v1661_v46, %s2224_s1  ;;  %v1991_v47 = vpop.f32.mrf.mxu0 }
 0x460   :  { %v1996_v48 = vpop.f32.mrf.mxu1 }
 0x4c4   :  { %v1668_v49 = vpop.permute.xlu0 %1667 }
 0x4c5   :  { %v1689_v55 = vsel %vm368_vm2, %v1129_v32, %v1668_v49 }
 0x4c8   :  { %v1676_v53 = vpop.permute.xlu0 %1675 }
 0x4c9   :  { %v1670_v52 = vpop.permute.xlu1 %1669  ;;  %v1692_v56 = vsel %vm1691_vm3, %v1689_v55, %v1676_v53 }
 0x4ca   :  { %v1690_v57 = vsel %vm368_vm2, %v1205_v30, %v1670_v52 }
 0x4cd   :  { %v1678_v54 = vpop.permute.xlu1 %1677 }
 0x4ce   :  { %v1693_v59 = vsel %vm1691_vm3, %v1690_v57, %v1678_v54 }
 0x4d0   :  { %v1684_v58 = vpop.permute.xlu0 %1683 }
 0x4d1   :  { %v1695_v60 = vsel %vm1694_vm4, %v1692_v56, %v1684_v58  ;;  %v1686_v61 = vpop.permute.xlu1 %1685 }
 0x4d2   :  { %v1696_v62 = vsel %vm1694_vm4, %v1693_v59, %v1686_v61  ;;  %2005 = vmatprep.mubr.msk.f32.mxu0 %vm166_vm0, %v1695_v60 }
 0x4d3   :  { %2006 = vmatmul.mubr.msk.f32.vlgmr.msra.gmra.mxu0 %vm166_vm0, %v1696_v62 }
 0x593   :  { %v2007_v0 = vpop.f32.mrf.mxu0 }
 0x594   :  { %v1786_v1 = vadd.f32 %v2007_v0, %v1842_v63 }
 0x595   :  { %v1780_v2 = vpop.f32.mrf.mxu0 }
 0x596   :  { %1790 = vst.msk [vmem:[#allocation13 + $0x8] sm:$0xff] %vm166_vm0, %v1786_v1  ;;  %v1781_v3 = vadd.f32 %v1842_v63, %v1780_v2 }
 0x598   :  { %1789 = vst.msk [vmem:[#allocation13] sm:$0xff] %vm166_vm0, %v1781_v3 }
 0x599   :  { %2189 = shalt.err (!%p2186_p6)
}
 0x59a   :  { %1802 = dma.vmem_to_hbm [thread:$0]  %s1797_s26, 256, %s2491_s9, [#allocation4], %s2209_s12, %s2209_s12, %s2210_s13  }
 0x59b   :  { %2206 = dma.done.wait [#allocation4], 256  }
 0x59c   :  { %2207 = vsyncadd [#allocation4], 4294967040 }
 0x59d   :  { %1806 = vsyncpa [#allocation3], 1 }
 0x59e   :  { %1807 = vsyncpa [#allocation6], 1 }
 0x59f   :  { %1808 = vsyncpa [#allocation9], 1 }
 0x5a0   :  { %1809 = vsyncpa [#allocation12], 1 }
 0x5a1   :  { %1810 = vsyncpa [#allocation4], 1 }

</bundles_post_ra>
